<compile_context>
chip_gen: v6e
topology: v6e:2x2x1
jax: 0.10.0
libtpu: 0.0.40
codegen_flags: <defaults>
</compile_context>

<pallas_src>
import math
from functools import partial

import jax
import jax.numpy as jnp
from jax.experimental import pallas as pl
from jax.experimental.pallas import tpu as pltpu


def _gelu(x):
    # tanh-approximate GELU (see TODO above re: exact erf form).
    c = 0.7978845608028654  # sqrt(2/pi)
    return 0.5 * x * (1.0 + jnp.tanh(c * (x + 0.044715 * x * x * x)))


def _round_up(v, m):
    return (v + m - 1) // m * m


def _conv3x3_flat(w_ref, src, stride, length):
    """3x3 conv as 9 shifted-window matmuls on a flat (C, N) layout.

    w_ref:  (9, Cout, Cin) VMEM ref (bf16), tap index = kh*3+kw
    src:    (Cin, N) bf16 value; flat padded spatial grid, row stride `stride`
            on the lane axis
    returns (Cout, length) f32; entry p = conv output at flat position p.
    """
    acc = None
    for kh in range(3):
        for kw in range(3):
            off = kh * stride + kw
            contrib = jnp.dot(w_ref[kh * 3 + kw], src[:, off:off + length],
                              preferred_element_type=jnp.float32)
            acc = contrib if acc is None else acc + contrib
    return acc


def _resblock_kernel(H, W, S, L1, L2, C,
                     x_ref, w1_ref, w2_ref, sc_ref, o_ref):
    # x_ref:  (C, NF)   one zero-embedded image, channel-major, flat spatial
    #                   grid (row stride S) on the lane axis
    # w*_ref: (9, C, C) conv taps, (kh*3+kw, cout, cin), bf16
    # sc_ref: (C, 4)    folded BN params: [scale1, shift1, scale2, shift2]
    # o_ref:  (C, L2)   output, same flat spatial grid (row stride S)
    xv = x_ref[...]
    xb = xv.astype(jnp.bfloat16)               # bf16 feed for the MXU

    s1 = sc_ref[:, 0:1]
    b1 = sc_ref[:, 1:2]
    s2 = sc_ref[:, 2:3]
    b2 = sc_ref[:, 3:4]

    # ---- conv1 + folded BN1 + GELU over flat positions [0, L1) -------------
    acc1 = _conv3x3_flat(w1_ref, xb, S, L1)            # (C, L1) f32
    y1 = _gelu(acc1 * s1 + b1)
    # Keep only the true conv1 outputs (grid rows 1..H, cols 1..W).  The
    # zeroed ring around them doubles as conv2's zero padding.  S is a power
    # of two, so the row/col tests are compares + one bitwise AND (no DMA'd
    # mask input, no integer division).
    pos = jax.lax.broadcasted_iota(jnp.int32, (C, L1), 1)
    col = pos & (S - 1)
    keep = (pos >= S) & (pos < (H + 1) * S) & (col >= 1) & (col <= W)
    y1 = jnp.where(keep, y1, 0.0).astype(jnp.bfloat16)  # (C, L1) bf16

    # ---- conv2 + folded BN2 + residual + GELU over flat positions [0, L2) --
    acc2 = _conv3x3_flat(w2_ref, y1, S, L2)            # (C, L2) f32
    resid = xv[:, 2 * S + 2:2 * S + 2 + L2].astype(jnp.float32)
    out = _gelu(acc2 * s2 + b2 + resid)
    o_ref[...] = out.astype(o_ref.dtype)


def resblock_forward(x, w1, b1, g1, be1, m1, v1, w2, b2, g2, be2, m2, v2,
                     eps=1e-5):
    """ResBlock forward. x: (B, C, H, W); conv weights: (C, C, 3, 3) OIHW."""
    B, C, H, W = x.shape

    # Flat padded spatial grid: rows of stride S (power of two) laid out along
    # the lane axis.  L2 covers every output position, L1 every conv1-grid
    # position conv2 reads, NF every input position conv1 reads.
    S = 8
    while S < W + 4:
        S *= 2
    assert S <= 128, "wide images need halo tiling (see TODO)"
    L2 = _round_up(H * S, 128)
    L1 = _round_up(L2 + 2 * S + 2, 128)
    NF = _round_up(L1 + 2 * S + 2, 128)
    R = NF // S
    assert L2 + 2 * S + 2 <= L1 and L1 + 2 * S + 2 <= NF and R >= H + 4

    # Embed x (zero padded by 2 on top/left; rest of the grid zero) into the
    # channel-major flat layout.
    xe = jnp.zeros((B, C, R, S), x.dtype)
    xe = xe.at[:, :, 2:H + 2, 2:W + 2].set(x)
    x_flat = xe.reshape(B, C, NF)

    # Fold eval-mode BatchNorm:  BN(conv(x)+b) = s*conv(x) + (s*(b-m)+beta).
    s1 = (g1 / jnp.sqrt(v1 + eps)).astype(jnp.float32)
    b1e = (s1 * (b1 - m1) + be1).astype(jnp.float32)
    s2 = (g2 / jnp.sqrt(v2 + eps)).astype(jnp.float32)
    b2e = (s2 * (b2 - m2) + be2).astype(jnp.float32)
    scales = jnp.stack([s1, b1e, s2, b2e], axis=1)      # (C, 4) f32

    # Conv weights: OIHW -> (tap, cout, cin), bf16 for the MXU.
    w1r = jnp.transpose(w1, (2, 3, 0, 1)).reshape(9, C, C).astype(jnp.bfloat16)
    w2r = jnp.transpose(w2, (2, 3, 0, 1)).reshape(9, C, C).astype(jnp.bfloat16)

    flops = 2 * B * 9 * C * C * (L1 + L2)
    transcendentals = B * C * (L1 + L2)
    bytes_accessed = (B * C * NF * x.dtype.itemsize
                      + B * 2 * 9 * C * C * 2 + B * 4 * C * 4
                      + B * C * L2 * x.dtype.itemsize)

    out_flat = pl.pallas_call(
        partial(_resblock_kernel, H, W, S, L1, L2, C),
        out_shape=jax.ShapeDtypeStruct((B, C, L2), x.dtype),
        grid_spec=pltpu.PrefetchScalarGridSpec(
            num_scalar_prefetch=0,
            grid=(B,),
            in_specs=[
                pl.BlockSpec((None, C, NF), lambda b: (b, 0, 0)),
                pl.BlockSpec((9, C, C), lambda b: (0, 0, 0)),
                pl.BlockSpec((9, C, C), lambda b: (0, 0, 0)),
                pl.BlockSpec((C, 4), lambda b: (0, 0)),
            ],
            out_specs=pl.BlockSpec((None, C, L2), lambda b: (b, 0, 0)),
        ),
        compiler_params=pltpu.CompilerParams(
            dimension_semantics=("parallel",),
        ),
        cost_estimate=pl.CostEstimate(
            flops=flops,
            transcendentals=transcendentals,
            bytes_accessed=bytes_accessed,
        ),
    )(x_flat, w1r, w2r, scales)

    # Strip the pad columns.  The kernel output is already channel-major
    # (NCHW-ordered), so this is a cheap slice + reshape; no transpose.
    return out_flat[:, :, :H * S].reshape(B, C, H, S)[:, :, :, :W]


def reference_resblock(x, w1, b1, g1, be1, m1, v1, w2, b2, g2, be2, m2, v2,
                       eps=1e-5, intermediate_dtype=jnp.float32):
    dn = ("NCHW", "OIHW", "NCHW")

    def bn(z, g, be, m, v):
        g = g[None, :, None, None]
        be = be[None, :, None, None]
        m = m[None, :, None, None]
        v = v[None, :, None, None]
        return (z - m) / jnp.sqrt(v + eps) * g + be

    y = jax.lax.conv_general_dilated(
        x, w1, window_strides=(1, 1), padding=((1, 1), (1, 1)),
        dimension_numbers=dn, precision=jax.lax.Precision.HIGHEST)
    y = _gelu(bn(y + b1[None, :, None, None], g1, be1, m1, v1))
    # optionally match the kernel's bf16 intermediate precision
    y = y.astype(intermediate_dtype).astype(jnp.float32)
    z = jax.lax.conv_general_dilated(
        y, w2, window_strides=(1, 1), padding=((1, 1), (1, 1)),
        dimension_numbers=dn, precision=jax.lax.Precision.HIGHEST)
    z = bn(z + b2[None, :, None, None], g2, be2, m2, v2)
    return _gelu(z + x)


if __name__ == "__main__":
    B, C, H, W = 2, 4, 16, 16
    keys = jax.random.split(jax.random.PRNGKey(0), 13)

    def bf16_exact(a):
        # keep test data exactly representable in bf16 so the only rounding
        # the kernel adds relative to f32 is the bf16 conv1->conv2 intermediate
        return a.astype(jnp.bfloat16).astype(jnp.float32)

    x = bf16_exact(jax.random.normal(keys[0], (B, C, H, W), jnp.float32))
    w1 = bf16_exact(jax.random.normal(keys[1], (C, C, 3, 3), jnp.float32)
                    * (1.0 / math.sqrt(9 * C)))
    b1 = bf16_exact(0.1 * jax.random.normal(keys[2], (C,), jnp.float32))
    g1 = bf16_exact(1.0 + 0.1 * jax.random.normal(keys[3], (C,), jnp.float32))
    be1 = bf16_exact(0.1 * jax.random.normal(keys[4], (C,), jnp.float32))
    m1 = bf16_exact(0.1 * jax.random.normal(keys[5], (C,), jnp.float32))
    v1 = bf16_exact(jax.random.uniform(keys[6], (C,), jnp.float32, 0.5, 1.5))
    w2 = bf16_exact(jax.random.normal(keys[7], (C, C, 3, 3), jnp.float32)
                    * (1.0 / math.sqrt(9 * C)))
    b2 = bf16_exact(0.1 * jax.random.normal(keys[8], (C,), jnp.float32))
    g2 = bf16_exact(1.0 + 0.1 * jax.random.normal(keys[9], (C,), jnp.float32))
    be2 = bf16_exact(0.1 * jax.random.normal(keys[10], (C,), jnp.float32))
    m2 = bf16_exact(0.1 * jax.random.normal(keys[11], (C,), jnp.float32))
    v2 = bf16_exact(jax.random.uniform(keys[12], (C,), jnp.float32, 0.5, 1.5))

    args = (x, w1, b1, g1, be1, m1, v1, w2, b2, g2, be2, m2, v2)

    out = resblock_forward(*args)
    jax.block_until_ready(out)
    assert out.shape == x.shape and out.dtype == x.dtype

    # Tight check against a reference with the same bf16 intermediate
    # precision as the kernel, plus a looser check against the pure-f32 math.
    ref_matched = reference_resblock(*args, intermediate_dtype=jnp.bfloat16)
    ref_f32 = reference_resblock(*args, intermediate_dtype=jnp.float32)
    err_matched = float(jnp.max(jnp.abs(out - ref_matched)))
    err_f32 = float(jnp.max(jnp.abs(out - ref_f32)))
    assert err_matched < 5e-3, (
        f"mismatch vs precision-matched reference, max abs err = {err_matched}")
    assert err_f32 < 2.5e-2, (
        f"mismatch vs f32 reference, max abs err = {err_f32}")

    print("KERNEL_OK")
</pallas_src>

<mosaic_0001>
module attributes {stable_mosaic.version = 11 : i64} {
  func.func @_resblock_kernel(%arg0: i32, %arg1: memref<1x4x768xf32, #tpu.memory_space<vmem>>, %arg2: memref<9x4x4xbf16, #tpu.memory_space<vmem>>, %arg3: memref<9x4x4xbf16, #tpu.memory_space<vmem>>, %arg4: memref<4x4xf32, #tpu.memory_space<vmem>>, %arg5: memref<1x4x512xf32, #tpu.memory_space<vmem>>) attributes {dimension_semantics = [#tpu.dimension_semantics<parallel>], iteration_bounds = array<i64: 2>, scalar_prefetch = 0 : i64, scratch_operands = 0 : i64, tpu.core_type = #tpu.core_type<tc>, window_params = [{transform_indices = @transform_0, window_bounds = array<i64: 1, 4, 768>}, {pipeline_mode = #tpu.pipeline_mode<synchronous>, transform_indices = @transform_1, window_bounds = array<i64: 9, 4, 4>}, {pipeline_mode = #tpu.pipeline_mode<synchronous>, transform_indices = @transform_2, window_bounds = array<i64: 9, 4, 4>}, {pipeline_mode = #tpu.pipeline_mode<synchronous>, transform_indices = @transform_3, window_bounds = array<i64: 4, 4>}, {transform_indices = @transform_4, window_bounds = array<i64: 1, 4, 512>}]} {
    %c0 = arith.constant 0 : index
    %c0_0 = arith.constant 0 : index
    %c0_1 = arith.constant 0 : index
    %0 = vector.load %arg1[%c0, %c0_0, %c0_1] : memref<1x4x768xf32, #tpu.memory_space<vmem>>, vector<1x4x768xf32>
    %1 = vector.shape_cast %0 : vector<1x4x768xf32> to vector<4x768xf32>
    %2 = arith.truncf %1 : vector<4x768xf32> to vector<4x768xbf16>
    %c0_2 = arith.constant 0 : index
    %c0_3 = arith.constant 0 : index
    %3 = vector.load %arg4[%c0_2, %c0_3] : memref<4x4xf32, #tpu.memory_space<vmem>>, vector<4x1xf32>
    %c0_4 = arith.constant 0 : index
    %c1 = arith.constant 1 : index
    %4 = vector.load %arg4[%c0_4, %c1] : memref<4x4xf32, #tpu.memory_space<vmem>>, vector<4x1xf32>
    %c0_5 = arith.constant 0 : index
    %c2 = arith.constant 2 : index
    %5 = vector.load %arg4[%c0_5, %c2] : memref<4x4xf32, #tpu.memory_space<vmem>>, vector<4x1xf32>
    %c0_6 = arith.constant 0 : index
    %c3 = arith.constant 3 : index
    %6 = vector.load %arg4[%c0_6, %c3] : memref<4x4xf32, #tpu.memory_space<vmem>>, vector<4x1xf32>
    %c0_7 = arith.constant 0 : index
    %c0_8 = arith.constant 0 : index
    %c0_9 = arith.constant 0 : index
    %7 = vector.load %arg2[%c0_7, %c0_8, %c0_9] : memref<9x4x4xbf16, #tpu.memory_space<vmem>>, vector<1x4x4xbf16>
    %8 = vector.shape_cast %7 : vector<1x4x4xbf16> to vector<4x4xbf16>
    %9 = vector.extract_strided_slice %2 {offsets = [0, 0], sizes = [4, 640], strides = [1, 1]} : vector<4x768xbf16> to vector<4x640xbf16>
    %cst = arith.constant dense<0.000000e+00> : vector<4x640xf32>
    %10 = tpu.matmul %8, %9, %cst {dimension_numbers = #tpu.dot_dimension_numbers<[1], [0], [0], [1], [0, 0, 1, 1], [], []>} : vector<4x4xbf16>, vector<4x640xbf16>, vector<4x640xf32> -> vector<4x640xf32>
    %c1_10 = arith.constant 1 : index
    %c0_11 = arith.constant 0 : index
    %c0_12 = arith.constant 0 : index
    %11 = vector.load %arg2[%c1_10, %c0_11, %c0_12] : memref<9x4x4xbf16, #tpu.memory_space<vmem>>, vector<1x4x4xbf16>
    %12 = vector.shape_cast %11 : vector<1x4x4xbf16> to vector<4x4xbf16>
    %13 = vector.extract_strided_slice %2 {offsets = [0, 1], sizes = [4, 640], strides = [1, 1]} : vector<4x768xbf16> to vector<4x640xbf16>
    %cst_13 = arith.constant dense<0.000000e+00> : vector<4x640xf32>
    %14 = tpu.matmul %12, %13, %cst_13 {dimension_numbers = #tpu.dot_dimension_numbers<[1], [0], [0], [1], [0, 0, 1, 1], [], []>} : vector<4x4xbf16>, vector<4x640xbf16>, vector<4x640xf32> -> vector<4x640xf32>
    %15 = arith.addf %10, %14 : vector<4x640xf32>
    %c2_14 = arith.constant 2 : index
    %c0_15 = arith.constant 0 : index
    %c0_16 = arith.constant 0 : index
    %16 = vector.load %arg2[%c2_14, %c0_15, %c0_16] : memref<9x4x4xbf16, #tpu.memory_space<vmem>>, vector<1x4x4xbf16>
    %17 = vector.shape_cast %16 : vector<1x4x4xbf16> to vector<4x4xbf16>
    %18 = vector.extract_strided_slice %2 {offsets = [0, 2], sizes = [4, 640], strides = [1, 1]} : vector<4x768xbf16> to vector<4x640xbf16>
    %cst_17 = arith.constant dense<0.000000e+00> : vector<4x640xf32>
    %19 = tpu.matmul %17, %18, %cst_17 {dimension_numbers = #tpu.dot_dimension_numbers<[1], [0], [0], [1], [0, 0, 1, 1], [], []>} : vector<4x4xbf16>, vector<4x640xbf16>, vector<4x640xf32> -> vector<4x640xf32>
    %20 = arith.addf %15, %19 : vector<4x640xf32>
    %c3_18 = arith.constant 3 : index
    %c0_19 = arith.constant 0 : index
    %c0_20 = arith.constant 0 : index
    %21 = vector.load %arg2[%c3_18, %c0_19, %c0_20] : memref<9x4x4xbf16, #tpu.memory_space<vmem>>, vector<1x4x4xbf16>
    %22 = vector.shape_cast %21 : vector<1x4x4xbf16> to vector<4x4xbf16>
    %23 = vector.extract_strided_slice %2 {offsets = [0, 32], sizes = [4, 640], strides = [1, 1]} : vector<4x768xbf16> to vector<4x640xbf16>
    %cst_21 = arith.constant dense<0.000000e+00> : vector<4x640xf32>
    %24 = tpu.matmul %22, %23, %cst_21 {dimension_numbers = #tpu.dot_dimension_numbers<[1], [0], [0], [1], [0, 0, 1, 1], [], []>} : vector<4x4xbf16>, vector<4x640xbf16>, vector<4x640xf32> -> vector<4x640xf32>
    %25 = arith.addf %20, %24 : vector<4x640xf32>
    %c4 = arith.constant 4 : index
    %c0_22 = arith.constant 0 : index
    %c0_23 = arith.constant 0 : index
    %26 = vector.load %arg2[%c4, %c0_22, %c0_23] : memref<9x4x4xbf16, #tpu.memory_space<vmem>>, vector<1x4x4xbf16>
    %27 = vector.shape_cast %26 : vector<1x4x4xbf16> to vector<4x4xbf16>
    %28 = vector.extract_strided_slice %2 {offsets = [0, 33], sizes = [4, 640], strides = [1, 1]} : vector<4x768xbf16> to vector<4x640xbf16>
    %cst_24 = arith.constant dense<0.000000e+00> : vector<4x640xf32>
    %29 = tpu.matmul %27, %28, %cst_24 {dimension_numbers = #tpu.dot_dimension_numbers<[1], [0], [0], [1], [0, 0, 1, 1], [], []>} : vector<4x4xbf16>, vector<4x640xbf16>, vector<4x640xf32> -> vector<4x640xf32>
    %30 = arith.addf %25, %29 : vector<4x640xf32>
    %c5 = arith.constant 5 : index
    %c0_25 = arith.constant 0 : index
    %c0_26 = arith.constant 0 : index
    %31 = vector.load %arg2[%c5, %c0_25, %c0_26] : memref<9x4x4xbf16, #tpu.memory_space<vmem>>, vector<1x4x4xbf16>
    %32 = vector.shape_cast %31 : vector<1x4x4xbf16> to vector<4x4xbf16>
    %33 = vector.extract_strided_slice %2 {offsets = [0, 34], sizes = [4, 640], strides = [1, 1]} : vector<4x768xbf16> to vector<4x640xbf16>
    %cst_27 = arith.constant dense<0.000000e+00> : vector<4x640xf32>
    %34 = tpu.matmul %32, %33, %cst_27 {dimension_numbers = #tpu.dot_dimension_numbers<[1], [0], [0], [1], [0, 0, 1, 1], [], []>} : vector<4x4xbf16>, vector<4x640xbf16>, vector<4x640xf32> -> vector<4x640xf32>
    %35 = arith.addf %30, %34 : vector<4x640xf32>
    %c6 = arith.constant 6 : index
    %c0_28 = arith.constant 0 : index
    %c0_29 = arith.constant 0 : index
    %36 = vector.load %arg2[%c6, %c0_28, %c0_29] : memref<9x4x4xbf16, #tpu.memory_space<vmem>>, vector<1x4x4xbf16>
    %37 = vector.shape_cast %36 : vector<1x4x4xbf16> to vector<4x4xbf16>
    %38 = vector.extract_strided_slice %2 {offsets = [0, 64], sizes = [4, 640], strides = [1, 1]} : vector<4x768xbf16> to vector<4x640xbf16>
    %cst_30 = arith.constant dense<0.000000e+00> : vector<4x640xf32>
    %39 = tpu.matmul %37, %38, %cst_30 {dimension_numbers = #tpu.dot_dimension_numbers<[1], [0], [0], [1], [0, 0, 1, 1], [], []>} : vector<4x4xbf16>, vector<4x640xbf16>, vector<4x640xf32> -> vector<4x640xf32>
    %40 = arith.addf %35, %39 : vector<4x640xf32>
    %c7 = arith.constant 7 : index
    %c0_31 = arith.constant 0 : index
    %c0_32 = arith.constant 0 : index
    %41 = vector.load %arg2[%c7, %c0_31, %c0_32] : memref<9x4x4xbf16, #tpu.memory_space<vmem>>, vector<1x4x4xbf16>
    %42 = vector.shape_cast %41 : vector<1x4x4xbf16> to vector<4x4xbf16>
    %43 = vector.extract_strided_slice %2 {offsets = [0, 65], sizes = [4, 640], strides = [1, 1]} : vector<4x768xbf16> to vector<4x640xbf16>
    %cst_33 = arith.constant dense<0.000000e+00> : vector<4x640xf32>
    %44 = tpu.matmul %42, %43, %cst_33 {dimension_numbers = #tpu.dot_dimension_numbers<[1], [0], [0], [1], [0, 0, 1, 1], [], []>} : vector<4x4xbf16>, vector<4x640xbf16>, vector<4x640xf32> -> vector<4x640xf32>
    %45 = arith.addf %40, %44 : vector<4x640xf32>
    %c8 = arith.constant 8 : index
    %c0_34 = arith.constant 0 : index
    %c0_35 = arith.constant 0 : index
    %46 = vector.load %arg2[%c8, %c0_34, %c0_35] : memref<9x4x4xbf16, #tpu.memory_space<vmem>>, vector<1x4x4xbf16>
    %47 = vector.shape_cast %46 : vector<1x4x4xbf16> to vector<4x4xbf16>
    %48 = vector.extract_strided_slice %2 {offsets = [0, 66], sizes = [4, 640], strides = [1, 1]} : vector<4x768xbf16> to vector<4x640xbf16>
    %cst_36 = arith.constant dense<0.000000e+00> : vector<4x640xf32>
    %49 = tpu.matmul %47, %48, %cst_36 {dimension_numbers = #tpu.dot_dimension_numbers<[1], [0], [0], [1], [0, 0, 1, 1], [], []>} : vector<4x4xbf16>, vector<4x640xbf16>, vector<4x640xf32> -> vector<4x640xf32>
    %50 = arith.addf %45, %49 : vector<4x640xf32>
    %51 = vector.broadcast %3 : vector<4x1xf32> to vector<4x640xf32>
    %52 = arith.mulf %50, %51 : vector<4x640xf32>
    %53 = vector.broadcast %4 : vector<4x1xf32> to vector<4x640xf32>
    %54 = arith.addf %52, %53 : vector<4x640xf32>
    %cst_37 = arith.constant 5.000000e-01 : f32
    %55 = vector.broadcast %cst_37 : f32 to vector<4x640xf32>
    %56 = arith.mulf %55, %54 : vector<4x640xf32>
    %cst_38 = arith.constant 4.471500e-02 : f32
    %57 = vector.broadcast %cst_38 : f32 to vector<4x640xf32>
    %58 = arith.mulf %57, %54 : vector<4x640xf32>
    %59 = arith.mulf %58, %54 : vector<4x640xf32>
    %60 = arith.mulf %59, %54 : vector<4x640xf32>
    %61 = arith.addf %54, %60 : vector<4x640xf32>
    %cst_39 = arith.constant 0.797884583 : f32
    %62 = vector.broadcast %cst_39 : f32 to vector<4x640xf32>
    %63 = arith.mulf %62, %61 : vector<4x640xf32>
    %64 = math.tanh %63 : vector<4x640xf32>
    %cst_40 = arith.constant 1.000000e+00 : f32
    %65 = vector.broadcast %cst_40 : f32 to vector<4x640xf32>
    %66 = arith.addf %65, %64 : vector<4x640xf32>
    %67 = arith.mulf %56, %66 : vector<4x640xf32>
    %68 = tpu.iota {dimensions = array<i32: 1>} : vector<4x640xi32>
    %c31_i32 = arith.constant 31 : i32
    %69 = vector.broadcast %c31_i32 : i32 to vector<4x640xi32>
    %70 = arith.andi %68, %69 : vector<4x640xi32>
    %c32_i32 = arith.constant 32 : i32
    %71 = vector.broadcast %c32_i32 : i32 to vector<4x640xi32>
    %72 = arith.cmpi sge, %68, %71 : vector<4x640xi32>
    %c544_i32 = arith.constant 544 : i32
    %73 = vector.broadcast %c544_i32 : i32 to vector<4x640xi32>
    %74 = arith.cmpi slt, %68, %73 : vector<4x640xi32>
    %75 = arith.andi %72, %74 : vector<4x640xi1>
    %c1_i32 = arith.constant 1 : i32
    %76 = vector.broadcast %c1_i32 : i32 to vector<4x640xi32>
    %77 = arith.cmpi sge, %70, %76 : vector<4x640xi32>
    %78 = arith.andi %75, %77 : vector<4x640xi1>
    %c16_i32 = arith.constant 16 : i32
    %79 = vector.broadcast %c16_i32 : i32 to vector<4x640xi32>
    %80 = arith.cmpi sle, %70, %79 : vector<4x640xi32>
    %81 = arith.andi %78, %80 : vector<4x640xi1>
    %cst_41 = arith.constant 0.000000e+00 : f32
    %82 = vector.broadcast %cst_41 : f32 to vector<4x640xf32>
    %83 = arith.select %81, %67, %82 : vector<4x640xi1>, vector<4x640xf32>
    %84 = arith.truncf %83 : vector<4x640xf32> to vector<4x640xbf16>
    %c0_42 = arith.constant 0 : index
    %c0_43 = arith.constant 0 : index
    %c0_44 = arith.constant 0 : index
    %85 = vector.load %arg3[%c0_42, %c0_43, %c0_44] : memref<9x4x4xbf16, #tpu.memory_space<vmem>>, vector<1x4x4xbf16>
    %86 = vector.shape_cast %85 : vector<1x4x4xbf16> to vector<4x4xbf16>
    %87 = vector.extract_strided_slice %84 {offsets = [0, 0], sizes = [4, 512], strides = [1, 1]} : vector<4x640xbf16> to vector<4x512xbf16>
    %cst_45 = arith.constant dense<0.000000e+00> : vector<4x512xf32>
    %88 = tpu.matmul %86, %87, %cst_45 {dimension_numbers = #tpu.dot_dimension_numbers<[1], [0], [0], [1], [0, 0, 1, 1], [], []>} : vector<4x4xbf16>, vector<4x512xbf16>, vector<4x512xf32> -> vector<4x512xf32>
    %c1_46 = arith.constant 1 : index
    %c0_47 = arith.constant 0 : index
    %c0_48 = arith.constant 0 : index
    %89 = vector.load %arg3[%c1_46, %c0_47, %c0_48] : memref<9x4x4xbf16, #tpu.memory_space<vmem>>, vector<1x4x4xbf16>
    %90 = vector.shape_cast %89 : vector<1x4x4xbf16> to vector<4x4xbf16>
    %91 = vector.extract_strided_slice %84 {offsets = [0, 1], sizes = [4, 512], strides = [1, 1]} : vector<4x640xbf16> to vector<4x512xbf16>
    %cst_49 = arith.constant dense<0.000000e+00> : vector<4x512xf32>
    %92 = tpu.matmul %90, %91, %cst_49 {dimension_numbers = #tpu.dot_dimension_numbers<[1], [0], [0], [1], [0, 0, 1, 1], [], []>} : vector<4x4xbf16>, vector<4x512xbf16>, vector<4x512xf32> -> vector<4x512xf32>
    %93 = arith.addf %88, %92 : vector<4x512xf32>
    %c2_50 = arith.constant 2 : index
    %c0_51 = arith.constant 0 : index
    %c0_52 = arith.constant 0 : index
    %94 = vector.load %arg3[%c2_50, %c0_51, %c0_52] : memref<9x4x4xbf16, #tpu.memory_space<vmem>>, vector<1x4x4xbf16>
    %95 = vector.shape_cast %94 : vector<1x4x4xbf16> to vector<4x4xbf16>
    %96 = vector.extract_strided_slice %84 {offsets = [0, 2], sizes = [4, 512], strides = [1, 1]} : vector<4x640xbf16> to vector<4x512xbf16>
    %cst_53 = arith.constant dense<0.000000e+00> : vector<4x512xf32>
    %97 = tpu.matmul %95, %96, %cst_53 {dimension_numbers = #tpu.dot_dimension_numbers<[1], [0], [0], [1], [0, 0, 1, 1], [], []>} : vector<4x4xbf16>, vector<4x512xbf16>, vector<4x512xf32> -> vector<4x512xf32>
    %98 = arith.addf %93, %97 : vector<4x512xf32>
    %c3_54 = arith.constant 3 : index
    %c0_55 = arith.constant 0 : index
    %c0_56 = arith.constant 0 : index
    %99 = vector.load %arg3[%c3_54, %c0_55, %c0_56] : memref<9x4x4xbf16, #tpu.memory_space<vmem>>, vector<1x4x4xbf16>
    %100 = vector.shape_cast %99 : vector<1x4x4xbf16> to vector<4x4xbf16>
    %101 = vector.extract_strided_slice %84 {offsets = [0, 32], sizes = [4, 512], strides = [1, 1]} : vector<4x640xbf16> to vector<4x512xbf16>
    %cst_57 = arith.constant dense<0.000000e+00> : vector<4x512xf32>
    %102 = tpu.matmul %100, %101, %cst_57 {dimension_numbers = #tpu.dot_dimension_numbers<[1], [0], [0], [1], [0, 0, 1, 1], [], []>} : vector<4x4xbf16>, vector<4x512xbf16>, vector<4x512xf32> -> vector<4x512xf32>
    %103 = arith.addf %98, %102 : vector<4x512xf32>
    %c4_58 = arith.constant 4 : index
    %c0_59 = arith.constant 0 : index
    %c0_60 = arith.constant 0 : index
    %104 = vector.load %arg3[%c4_58, %c0_59, %c0_60] : memref<9x4x4xbf16, #tpu.memory_space<vmem>>, vector<1x4x4xbf16>
    %105 = vector.shape_cast %104 : vector<1x4x4xbf16> to vector<4x4xbf16>
    %106 = vector.extract_strided_slice %84 {offsets = [0, 33], sizes = [4, 512], strides = [1, 1]} : vector<4x640xbf16> to vector<4x512xbf16>
    %cst_61 = arith.constant dense<0.000000e+00> : vector<4x512xf32>
    %107 = tpu.matmul %105, %106, %cst_61 {dimension_numbers = #tpu.dot_dimension_numbers<[1], [0], [0], [1], [0, 0, 1, 1], [], []>} : vector<4x4xbf16>, vector<4x512xbf16>, vector<4x512xf32> -> vector<4x512xf32>
    %108 = arith.addf %103, %107 : vector<4x512xf32>
    %c5_62 = arith.constant 5 : index
    %c0_63 = arith.constant 0 : index
    %c0_64 = arith.constant 0 : index
    %109 = vector.load %arg3[%c5_62, %c0_63, %c0_64] : memref<9x4x4xbf16, #tpu.memory_space<vmem>>, vector<1x4x4xbf16>
    %110 = vector.shape_cast %109 : vector<1x4x4xbf16> to vector<4x4xbf16>
    %111 = vector.extract_strided_slice %84 {offsets = [0, 34], sizes = [4, 512], strides = [1, 1]} : vector<4x640xbf16> to vector<4x512xbf16>
    %cst_65 = arith.constant dense<0.000000e+00> : vector<4x512xf32>
    %112 = tpu.matmul %110, %111, %cst_65 {dimension_numbers = #tpu.dot_dimension_numbers<[1], [0], [0], [1], [0, 0, 1, 1], [], []>} : vector<4x4xbf16>, vector<4x512xbf16>, vector<4x512xf32> -> vector<4x512xf32>
    %113 = arith.addf %108, %112 : vector<4x512xf32>
    %c6_66 = arith.constant 6 : index
    %c0_67 = arith.constant 0 : index
    %c0_68 = arith.constant 0 : index
    %114 = vector.load %arg3[%c6_66, %c0_67, %c0_68] : memref<9x4x4xbf16, #tpu.memory_space<vmem>>, vector<1x4x4xbf16>
    %115 = vector.shape_cast %114 : vector<1x4x4xbf16> to vector<4x4xbf16>
    %116 = vector.extract_strided_slice %84 {offsets = [0, 64], sizes = [4, 512], strides = [1, 1]} : vector<4x640xbf16> to vector<4x512xbf16>
    %cst_69 = arith.constant dense<0.000000e+00> : vector<4x512xf32>
    %117 = tpu.matmul %115, %116, %cst_69 {dimension_numbers = #tpu.dot_dimension_numbers<[1], [0], [0], [1], [0, 0, 1, 1], [], []>} : vector<4x4xbf16>, vector<4x512xbf16>, vector<4x512xf32> -> vector<4x512xf32>
    %118 = arith.addf %113, %117 : vector<4x512xf32>
    %c7_70 = arith.constant 7 : index
    %c0_71 = arith.constant 0 : index
    %c0_72 = arith.constant 0 : index
    %119 = vector.load %arg3[%c7_70, %c0_71, %c0_72] : memref<9x4x4xbf16, #tpu.memory_space<vmem>>, vector<1x4x4xbf16>
    %120 = vector.shape_cast %119 : vector<1x4x4xbf16> to vector<4x4xbf16>
    %121 = vector.extract_strided_slice %84 {offsets = [0, 65], sizes = [4, 512], strides = [1, 1]} : vector<4x640xbf16> to vector<4x512xbf16>
    %cst_73 = arith.constant dense<0.000000e+00> : vector<4x512xf32>
    %122 = tpu.matmul %120, %121, %cst_73 {dimension_numbers = #tpu.dot_dimension_numbers<[1], [0], [0], [1], [0, 0, 1, 1], [], []>} : vector<4x4xbf16>, vector<4x512xbf16>, vector<4x512xf32> -> vector<4x512xf32>
    %123 = arith.addf %118, %122 : vector<4x512xf32>
    %c8_74 = arith.constant 8 : index
    %c0_75 = arith.constant 0 : index
    %c0_76 = arith.constant 0 : index
    %124 = vector.load %arg3[%c8_74, %c0_75, %c0_76] : memref<9x4x4xbf16, #tpu.memory_space<vmem>>, vector<1x4x4xbf16>
    %125 = vector.shape_cast %124 : vector<1x4x4xbf16> to vector<4x4xbf16>
    %126 = vector.extract_strided_slice %84 {offsets = [0, 66], sizes = [4, 512], strides = [1, 1]} : vector<4x640xbf16> to vector<4x512xbf16>
    %cst_77 = arith.constant dense<0.000000e+00> : vector<4x512xf32>
    %127 = tpu.matmul %125, %126, %cst_77 {dimension_numbers = #tpu.dot_dimension_numbers<[1], [0], [0], [1], [0, 0, 1, 1], [], []>} : vector<4x4xbf16>, vector<4x512xbf16>, vector<4x512xf32> -> vector<4x512xf32>
    %128 = arith.addf %123, %127 : vector<4x512xf32>
    %129 = vector.extract_strided_slice %1 {offsets = [0, 66], sizes = [4, 512], strides = [1, 1]} : vector<4x768xf32> to vector<4x512xf32>
    %130 = vector.broadcast %5 : vector<4x1xf32> to vector<4x512xf32>
    %131 = arith.mulf %128, %130 : vector<4x512xf32>
    %132 = vector.broadcast %6 : vector<4x1xf32> to vector<4x512xf32>
    %133 = arith.addf %131, %132 : vector<4x512xf32>
    %134 = arith.addf %133, %129 : vector<4x512xf32>
    %cst_78 = arith.constant 5.000000e-01 : f32
    %135 = vector.broadcast %cst_78 : f32 to vector<4x512xf32>
    %136 = arith.mulf %135, %134 : vector<4x512xf32>
    %cst_79 = arith.constant 4.471500e-02 : f32
    %137 = vector.broadcast %cst_79 : f32 to vector<4x512xf32>
    %138 = arith.mulf %137, %134 : vector<4x512xf32>
    %139 = arith.mulf %138, %134 : vector<4x512xf32>
    %140 = arith.mulf %139, %134 : vector<4x512xf32>
    %141 = arith.addf %134, %140 : vector<4x512xf32>
    %cst_80 = arith.constant 0.797884583 : f32
    %142 = vector.broadcast %cst_80 : f32 to vector<4x512xf32>
    %143 = arith.mulf %142, %141 : vector<4x512xf32>
    %144 = math.tanh %143 : vector<4x512xf32>
    %cst_81 = arith.constant 1.000000e+00 : f32
    %145 = vector.broadcast %cst_81 : f32 to vector<4x512xf32>
    %146 = arith.addf %145, %144 : vector<4x512xf32>
    %147 = arith.mulf %136, %146 : vector<4x512xf32>
    %c0_82 = arith.constant 0 : index
    %c0_83 = arith.constant 0 : index
    %c0_84 = arith.constant 0 : index
    %148 = vector.load %arg5[%c0_82, %c0_83, %c0_84] : memref<1x4x512xf32, #tpu.memory_space<vmem>>, vector<1x4x512xf32>
    %149 = vector.shape_cast %148 : vector<1x4x512xf32> to vector<4x512xf32>
    %150 = vector.shape_cast %147 : vector<4x512xf32> to vector<1x4x512xf32>
    tpu.vector_store %arg5[%c0_82, %c0_83, %c0_84], %150 {strides = array<i32>} : memref<1x4x512xf32, #tpu.memory_space<vmem>>, vector<1x4x512xf32>,
    return
  }
  func.func @transform_0(%arg0: i32) -> (i32, i32, i32) {
    %c0_i32 = arith.constant 0 : i32
    %c0_i32_0 = arith.constant 0 : i32
    %c0_i32_1 = arith.constant 0 : i32
    return %arg0, %c0_i32, %c0_i32_0 : i32, i32, i32
  }
  func.func @transform_1(%arg0: i32) -> (i32, i32, i32) {
    %c0_i32 = arith.constant 0 : i32
    %c0_i32_0 = arith.constant 0 : i32
    %c0_i32_1 = arith.constant 0 : i32
    %c0_i32_2 = arith.constant 0 : i32
    return %c0_i32, %c0_i32_0, %c0_i32_1 : i32, i32, i32
  }
  func.func @transform_2(%arg0: i32) -> (i32, i32, i32) {
    %c0_i32 = arith.constant 0 : i32
    %c0_i32_0 = arith.constant 0 : i32
    %c0_i32_1 = arith.constant 0 : i32
    %c0_i32_2 = arith.constant 0 : i32
    return %c0_i32, %c0_i32_0, %c0_i32_1 : i32, i32, i32
  }
  func.func @transform_3(%arg0: i32) -> (i32, i32) {
    %c0_i32 = arith.constant 0 : i32
    %c0_i32_0 = arith.constant 0 : i32
    %c0_i32_1 = arith.constant 0 : i32
    return %c0_i32, %c0_i32_0 : i32, i32
  }
  func.func @transform_4(%arg0: i32) -> (i32, i32, i32) {
    %c0_i32 = arith.constant 0 : i32
    %c0_i32_0 = arith.constant 0 : i32
    %c0_i32_1 = arith.constant 0 : i32
    return %arg0, %c0_i32, %c0_i32_0 : i32, i32, i32
  }
}

</mosaic_0001>

<bundles_post_ra>
// kernel: tpu_custom_call.1
= control target key start
LH: loop header
LB: loop body
LE: loop exit
PB: predicated region body
PF: predicated region fallthrough
CT: control target
= control target key end

     0   :  { %9 = vsyncpa [#allocation3], 0  ;;  %s4099_s0 = inlined_call_operand.vmem [shape: f32[2,4,768], index: 0, kind: input, shape index: {}]   ;;  %s4100_s1 = inlined_call_operand.vmem [shape: bf16[9,4,4], index: 1, kind: input, shape index: {}]   ;;  %s4101_s2 = inlined_call_operand.vmem [shape: bf16[9,4,4], index: 2, kind: input, shape index: {}]   ;;  %s4102_s3 = inlined_call_operand.vmem [shape: f32[4,4], index: 3, kind: input, shape index: {}]   ;;  %s4103_s4 = inlined_call_operand.hbm [shape: f32[2,4,512], index: 4, kind: output, shape index: {}]  }
   0x1   :  { %11 = vsyncpa [#allocation3 + $0x1], 0  ;;  %s3360_s15 = smov 0   ;;  %s3362_s16 = smov 0  }
   0x2   :  { %s3364_s17 = smov 0   ;;  %s3366_s18 = smov 0  }
   0x3 LB: > { %s3381_s19 = sadd.s32 4294967295, %s3318_s18   ;;  %s2994_s20 = sadd.s32 4294967294, %s3318_s18   ;;  %s3318_s18 = sphi %s3366_s18, %s4149_s18   ;;  %s3314_s17 = sphi %s3364_s17, %s4148_s17   ;;  %s3310_s16 = sphi %s3362_s16, %s4147_s16   ;;  %s3306_s15 = sphi %s3360_s15, %s4146_s15  }
   0x4   : > { %s3385_s21 = sadd.s32 1, %s3318_s18   ;;  %s113_s22 = sadd.s32 1, %s3314_s17 }
   0x5   : > { %s110_s23 = ssub.s32 %s3318_s18, %s3385_s21  ;;  %p123_p0 = scmp.ne.s32.totalorder %s3314_s17, %s3310_s16 }
   0x6   : > { %p111_p1 = scmp.eq.s32.totalorder %s110_s23, 0  ;;  %p124_p2 = scmp.eq.s32.totalorder %s3381_s19, 1 }
   0x7   : > { %p129_p3 = scmp.ne.s32.totalorder %s3310_s16, %s3306_s15  ;;  %p130_p4 = scmp.eq.s32.totalorder %s2994_s20, 1 }
   0x8   : > { %s3396_s24 = scalar_select %p111_p1, %s3314_s17, %s113_s22  }
   0x9   : > { %p3398_p5 = por %p124_p2, %p123_p0  ;;  %p3402_p6 = por %p130_p4, %p129_p3 }
   0xa   : > { %p2997_p7 = scmp.ge.s32.totalorder %s3318_s18, 1  ;;  %p165_p8 = scmp.lt.s32.totalorder %s3318_s18, 3 }
   0xc   : > { %p166_p9 = pnand %p2997_p7, %p165_p8 }
   0xd   : > { %p191_p10 = scmp.lt.s32.totalorder (!%p166_p9), %s3381_s19, 1  ;;  %s3321_s6 = smov (!%p166_p9), 127  }
   0xe   : > { %169 = sbr.rel (%p166_p9) target bundleno = 919 (0x397), region = 36  ;;  %s3322_s7 = smov (!%p166_p9), 126  }
   0xf   : > { %s3323_s8 = smov (!%p166_p9), 96   ;;  %s3324_s9 = smov (!%p166_p9), 95  }
  0x10   : > { %s3325_s10 = smov (!%p166_p9), 94   ;;  %s3326_s11 = smov (!%p166_p9), 64  }
  0x11   : > { %s3327_s12 = smov (!%p166_p9), 63   ;;  %s3328_s13 = smov (!%p166_p9), 62  }
  0x12   : > { %s3334_s14 = smov (!%p166_p9), [#allocation2]  }
  0x13   : > { %s192_s27 = scalar_select %p191_p10, %s3381_s19, 1  ;;  %v3320_v0 = vmov 0   ;;  %v215_v13 = vld [vmem:[%s4102_s3] sm:$0xf]  ;;  %v3329_v14 = vmov 1   ;;  %vm237_vm0 = vcmask 1039360  }
  0x14   : > { %295 = vmatprep.mubr.bf16.mxu0 %v3320_v0  ;;  %336 = vmatprep.mubr.bf16.mxu1 %v3320_v0  ;;  %vm247_vm1 = vcmask 1041408   ;;  %v3000_v22 = vld [vmem:[%s4100_s1 + $0x2] sm:$0x3]  ;;  %vm243_vm2 = vcmask 31744   ;;  %v3330_v26 = vmov 0.0   ;;  %vm3331_vm3 = vmmov 0  }
  0x15   : > { %s3175_s28 = smul.u32 24, %s192_s27  ;;  %3229 = vset.pattern.permute.xlu0 %v3320_v0  ;;  %3230 = vset.pattern.permute.xlu1 %v3329_v14  ;;  %vm539_vm4 = vcmask 1031168   ;;  %v216_v38 = vld [vmem:[%s4100_s1] sm:$0x3]  ;;  %vm704_vm5 = vcmask 785408   ;;  %vm869_vm6 = vcmask 777216  }
  0x16   : > { %v3011_v53 = vld [vmem:[%s4100_s1 + $0x4] sm:$0x3]  ;;  %vm4107_vm7 = vcmask 769024   ;;  %vm4106_vm8 = vcmask 523264   ;;  %vm4105_vm9 = vcmask 515072   ;;  %vm4104_vm10 = vcmask 506880  }
  0x17   : > { %s3415_s5 = scalar_lea.vmem %s4099_s0, %s3175_s28 }
  0x18   : > { %v198_v1 = vld [vmem:[%s3415_s5 + $0x8] sm:$0xff]  ;;  %v197_v2 = vld [vmem:[%s3415_s5] sm:$0xff]  ;;  %v199_v3 = vld [vmem:[%s3415_s5 + $0x10] sm:$0xff] }
  0x19   : > { %v3421_v4 = vpack.c.bf16 %v198_v1, %v198_v1  ;;  %v3423_v5 = vpack.c.bf16 %v197_v2, %v197_v2  ;;  %v3425_v6 = vcombine.high %v198_v1, %v198_v1  ;;  %v3427_v7 = vcombine.high %v197_v2, %v197_v2 }
  0x1a   : > { %v205_v10 = vcombine.high %v199_v3, %v199_v3  ;;  %v3445_v11 = vpack.c.bf16 %v199_v3, %v199_v3 }
  0x1b   : > { %229 = vrot.lane.b32.xlu1 %v3421_v4, %s3321_s6  ;;  %225 = vrot.lane.b32.xlu0 %v3423_v5, %s3321_s6  ;;  %v3435_v8 = vpack.c.bf16 %v3425_v6, %v3425_v6  ;;  %v3439_v9 = vpack.c.bf16 %v3427_v7, %v3427_v7  ;;  %v389_v31 = vsel %vm247_vm1, %v3423_v5, 0  ;;  %v395_v34 = vsel %vm247_vm1, %v3421_v4, 0 }
  0x1c   : > { %v214_v12 = vpack.c.bf16 %v205_v10, %v205_v10  ;;  %v401_v39 = vsel %vm247_vm1, %v3445_v11, 0 }
  0x1f   : > { %231 = vrot.lane.b32.xlu1 %v3435_v8, %s3321_s6  ;;  %227 = vrot.lane.b32.xlu0 %v3439_v9, %s3321_s6 }
  0x23   : > { %235 = vrot.lane.b32.xlu1 %v214_v12, %s3321_s6  ;;  %233 = vrot.lane.b32.xlu0 %v3445_v11, %s3321_s6 }
  0x27   : > { %527 = vrot.lane.b32.xlu0 %v3423_v5, %s3322_s7  ;;  %529 = vrot.lane.b32.xlu1 %v3439_v9, %s3322_s7 }
  0x2b   : > { %531 = vrot.lane.b32.xlu0 %v3421_v4, %s3322_s7  ;;  %533 = vrot.lane.b32.xlu1 %v3435_v8, %s3322_s7 }
  0x2f   : > { %535 = vrot.lane.b32.xlu0 %v3445_v11, %s3322_s7  ;;  %537 = vrot.lane.b32.xlu1 %v214_v12, %s3322_s7 }
  0x33   : > { %692 = vrot.lane.b32.xlu0 %v3423_v5, %s3323_s8  ;;  %694 = vrot.lane.b32.xlu1 %v3439_v9, %s3323_s8 }
  0x37   : > { %696 = vrot.lane.b32.xlu0 %v3421_v4, %s3323_s8  ;;  %698 = vrot.lane.b32.xlu1 %v3435_v8, %s3323_s8 }
  0x3b   : > { %700 = vrot.lane.b32.xlu0 %v3445_v11, %s3323_s8  ;;  %702 = vrot.lane.b32.xlu1 %v214_v12, %s3323_s8 }
  0x3f   : > { %857 = vrot.lane.b32.xlu0 %v3423_v5, %s3324_s9  ;;  %859 = vrot.lane.b32.xlu1 %v3439_v9, %s3324_s9 }
  0x43   : > { %861 = vrot.lane.b32.xlu0 %v3421_v4, %s3324_s9  ;;  %863 = vrot.lane.b32.xlu1 %v3435_v8, %s3324_s9 }
  0x47   : > { %865 = vrot.lane.b32.xlu0 %v3445_v11, %s3324_s9  ;;  %867 = vrot.lane.b32.xlu1 %v214_v12, %s3324_s9 }
  0x4b   : > { %1022 = vrot.lane.b32.xlu0 %v3423_v5, %s3325_s10  ;;  %1024 = vrot.lane.b32.xlu1 %v3439_v9, %s3325_s10 }
  0x4f   : > { %1026 = vrot.lane.b32.xlu0 %v3421_v4, %s3325_s10  ;;  %1028 = vrot.lane.b32.xlu1 %v3435_v8, %s3325_s10 }
  0x53   : > { %1030 = vrot.lane.b32.xlu0 %v3445_v11, %s3325_s10  ;;  %1032 = vrot.lane.b32.xlu1 %v214_v12, %s3325_s10 }
  0x57   : > { %1187 = vrot.lane.b32.xlu0 %v3423_v5, %s3326_s11  ;;  %1189 = vrot.lane.b32.xlu1 %v3439_v9, %s3326_s11 }
  0x5b   : > { %1191 = vrot.lane.b32.xlu0 %v3421_v4, %s3326_s11  ;;  %1193 = vrot.lane.b32.xlu1 %v3435_v8, %s3326_s11 }
  0x5f   : > { %1195 = vrot.lane.b32.xlu0 %v3445_v11, %s3326_s11  ;;  %1197 = vrot.lane.b32.xlu1 %v214_v12, %s3326_s11 }
  0x63   : > { %1352 = vrot.lane.b32.xlu0 %v3423_v5, %s3327_s12  ;;  %1354 = vrot.lane.b32.xlu1 %v3439_v9, %s3327_s12 }
  0x67   : > { %1356 = vrot.lane.b32.xlu0 %v3421_v4, %s3327_s12  ;;  %1358 = vrot.lane.b32.xlu1 %v3435_v8, %s3327_s12 }
  0x6b   : > { %1360 = vrot.lane.b32.xlu0 %v3445_v11, %s3327_s12  ;;  %1362 = vrot.lane.b32.xlu1 %v214_v12, %s3327_s12 }
  0x6f   : > { %1517 = vrot.lane.b32.xlu0 %v3423_v5, %s3328_s13  ;;  %1519 = vrot.lane.b32.xlu1 %v3439_v9, %s3328_s13  ;;  %v3017_v5 = vld [vmem:[%s4100_s1 + $0x6] sm:$0x3] }
  0x73   : > { %1521 = vrot.lane.b32.xlu0 %v3421_v4, %s3328_s13  ;;  %1523 = vrot.lane.b32.xlu1 %v3435_v8, %s3328_s13 }
  0x77   : > { %1525 = vrot.lane.b32.xlu0 %v3445_v11, %s3328_s13  ;;  %1527 = vrot.lane.b32.xlu1 %v214_v12, %s3328_s13 }
  0x7b   : > { %1682 = vperm.xlu0 %3229, %v215_v13   ;;  %1691 = vperm.xlu1 %3230, %v215_v13  }
  0x8d   : > { %v230_v15 = vpop.permute.xlu1 %229  ;;  %v226_v16 = vpop.permute.xlu0 %225 }
  0x91   : > { %v232_v17 = vpop.permute.xlu1 %231  ;;  %v228_v18 = vpop.permute.xlu0 %227 }
  0x92   : > { %v239_v19 = vsel %vm237_vm0, %v228_v18, %v230_v15  ;;  %v238_v20 = vsel %vm237_vm0, %v226_v16, %v228_v18  ;;  %v240_v23 = vsel %vm237_vm0, %v230_v15, %v232_v17 }
  0x93   : > { %3001 = vmatprep.subr.msk.bf16.mxu0 %vm247_vm1, %v239_v19  ;;  %v249_v21 = vsel %vm247_vm1, %v238_v20, 0  ;;  %v255_v30 = vsel %vm247_vm1, %v240_v23, 0 }
  0x94   : > { %278 = vmatpush1.bf16.msra.mxu0 %v249_v21 }
  0x95   : > { %v236_v24 = vpop.permute.xlu1 %235  ;;  %v234_v25 = vpop.permute.xlu0 %233  ;;  %3121 = vmatprep.subr.bf16.mxu0 %v3330_v26 }
  0x96   : > { %v242_v27 = vsel %vm237_vm0, %v234_v25, %v236_v24  ;;  %v241_v28 = vsel %vm237_vm0, %v232_v17, %v234_v25 }
  0x97   : > { %v261_v29 = vsel %vm247_vm1, %v242_v27, 0  ;;  %3002 = vmatmul.mubr.msk.bf16.vlgmr.msra.gmra.mxu0 %vm243_vm2, %v3000_v22  ;;  %3003 = vmatprep.subr.msk.bf16.mxu1 %vm247_vm1, %v241_v28 }
  0x98   : > { %319 = vmatpush1.bf16.msra.mxu1 %v255_v30  ;;  %3122 = vmatpush3.bf16.msra.mxu0 %v261_v29 }
  0x99   : > { %3123 = vmatprep.mubr.msk.bf16.mxu0 %vm3331_vm3, %v3330_v26  ;;  %3006 = vmatprep.subr.msk.bf16.mxu1 %vm247_vm1, %v3439_v9  ;;  %v528_v32 = vpop.permute.xlu0 %527  ;;  %v530_v33 = vpop.permute.xlu1 %529 }
  0x9a   : > { %3008 = vmatprep.subr.msk.bf16.mxu0 %vm247_vm1, %v3435_v8  ;;  %v540_v42 = vsel %vm539_vm4, %v528_v32, %v530_v33 }
  0x9b   : > { %3004 = vmatmul.mubr.msk.bf16.vlgmr.msra.gmra.mxu1 %vm243_vm2, %v3000_v22  ;;  %v549_v44 = vsel %vm247_vm1, %v540_v42, 0 }
  0x9c   : > { %418 = vmatpush1.bf16.msra.mxu1 %v389_v31  ;;  %435 = vmatprep.mubr.bf16.mxu1 %v3320_v0 }
  0x9d   : > { %v532_v35 = vpop.permute.xlu0 %531  ;;  %3127 = vmatprep.subr.bf16.mxu1 %v3330_v26  ;;  %v534_v36 = vpop.permute.xlu1 %533 }
  0x9e   : > { %v541_v37 = vsel %vm539_vm4, %v530_v33, %v532_v35  ;;  %v542_v47 = vsel %vm539_vm4, %v532_v35, %v534_v36 }
  0x9f   : > { %3124 = vmatmul.mubr.msk.bf16.vlgmr.msra.gmra.mxu0 %vm243_vm2, %v3000_v22  ;;  %v555_v48 = vsel %vm247_vm1, %v542_v47, 0  ;;  %v3023_v22 = vld [vmem:[%s4100_s1 + $0x8] sm:$0x3] }
  0xa0   : > { %459 = vmatpush1.bf16.msra.mxu0 %v395_v34  ;;  %476 = vmatprep.mubr.bf16.mxu0 %v3320_v0 }
  0xa1   : > { %3012 = vmatprep.subr.msk.bf16.mxu0 %vm247_vm1, %v541_v37  ;;  %v536_v40 = vpop.permute.xlu0 %535  ;;  %v538_v41 = vpop.permute.xlu1 %537 }
  0xa2   : > { %v543_v43 = vsel %vm539_vm4, %v534_v36, %v536_v40  ;;  %v544_v51 = vsel %vm539_vm4, %v536_v40, %v538_v41 }
  0xa3   : > { %3007 = vmatmul.mubr.msk.bf16.vlgmr.msra.gmra.mxu1 %vm243_vm2, %v216_v38  ;;  %v561_v54 = vsel %vm247_vm1, %v544_v51, 0 }
  0xa4   : > { %3128 = vmatpush3.bf16.msra.mxu1 %v401_v39  ;;  %3129 = vmatprep.mubr.msk.bf16.mxu1 %vm3331_vm3, %v3330_v26 }
  0xa5   : > { %3014 = vmatprep.subr.msk.bf16.mxu1 %vm247_vm1, %v543_v43  ;;  %v693_v45 = vpop.permute.xlu0 %692  ;;  %v695_v46 = vpop.permute.xlu1 %694 }
  0xa6   : > { %v705_v57 = vsel %vm704_vm5, %v693_v45, %v695_v46 }
  0xa7   : > { %3009 = vmatmul.mubr.msk.bf16.vlgmr.msra.gmra.mxu0 %vm243_vm2, %v216_v38  ;;  %v714_v59 = vsel %vm247_vm1, %v705_v57, 0 }
  0xa8   : > { %578 = vmatpush1.bf16.msra.mxu0 %v549_v44  ;;  %595 = vmatprep.mubr.bf16.mxu0 %v3320_v0 }
  0xa9   : > { %3133 = vmatprep.subr.bf16.mxu0 %v3330_v26  ;;  %v697_v49 = vpop.permute.xlu0 %696  ;;  %v699_v50 = vpop.permute.xlu1 %698 }
  0xaa   : > { %v706_v52 = vsel %vm704_vm5, %v695_v46, %v697_v49  ;;  %v707_v62 = vsel %vm704_vm5, %v697_v49, %v699_v50 }
  0xab   : > { %3130 = vmatmul.mubr.msk.bf16.vlgmr.msra.gmra.mxu1 %vm243_vm2, %v216_v38  ;;  %v720_v63 = vsel %vm247_vm1, %v707_v62, 0  ;;  %v3029_v38 = vld [vmem:[%s4100_s1 + $0xa] sm:$0x3] }
  0xac   : > { %619 = vmatpush1.bf16.msra.mxu1 %v555_v48  ;;  %636 = vmatprep.mubr.bf16.mxu1 %v3320_v0 }
  0xad   : > { %3018 = vmatprep.subr.msk.bf16.mxu1 %vm247_vm1, %v706_v52  ;;  %v701_v55 = vpop.permute.xlu0 %700  ;;  %v703_v56 = vpop.permute.xlu1 %702 }
  0xae   : > { %v708_v58 = vsel %vm704_vm5, %v699_v50, %v701_v55  ;;  %v709_v3 = vsel %vm704_vm5, %v701_v55, %v703_v56 }
  0xaf   : > { %3013 = vmatmul.mubr.msk.bf16.vlgmr.msra.gmra.mxu0 %vm243_vm2, %v3011_v53  ;;  %v726_v8 = vsel %vm247_vm1, %v709_v3, 0 }
  0xb0   : > { %3134 = vmatpush3.bf16.msra.mxu0 %v561_v54  ;;  %3135 = vmatprep.mubr.msk.bf16.mxu0 %vm3331_vm3, %v3330_v26 }
  0xb1   : > { %3020 = vmatprep.subr.msk.bf16.mxu0 %vm247_vm1, %v708_v58  ;;  %v858_v60 = vpop.permute.xlu0 %857  ;;  %v860_v61 = vpop.permute.xlu1 %859 }
  0xb2   : > { %v870_v11 = vsel %vm869_vm6, %v858_v60, %v860_v61 }
  0xb3   : > { %3015 = vmatmul.mubr.msk.bf16.vlgmr.msra.gmra.mxu1 %vm243_vm2, %v3011_v53  ;;  %v879_v13 = vsel %vm247_vm1, %v870_v11, 0 }
  0xb4   : > { %743 = vmatpush1.bf16.msra.mxu1 %v714_v59  ;;  %760 = vmatprep.mubr.bf16.mxu1 %v3320_v0 }
  0xb5   : > { %3139 = vmatprep.subr.bf16.mxu1 %v3330_v26  ;;  %v862_v1 = vpop.permute.xlu0 %861  ;;  %v864_v2 = vpop.permute.xlu1 %863 }
  0xb6   : > { %v871_v4 = vsel %vm869_vm6, %v860_v61, %v862_v1  ;;  %v872_v16 = vsel %vm869_vm6, %v862_v1, %v864_v2 }
  0xb7   : > { %3136 = vmatmul.mubr.msk.bf16.vlgmr.msra.gmra.mxu0 %vm243_vm2, %v3011_v53  ;;  %v885_v17 = vsel %vm247_vm1, %v872_v16, 0  ;;  %v3035_v53 = vld [vmem:[%s4100_s1 + $0xc] sm:$0x3] }
  0xb8   : > { %784 = vmatpush1.bf16.msra.mxu0 %v720_v63  ;;  %801 = vmatprep.mubr.bf16.mxu0 %v3320_v0 }
  0xb9   : > { %3024 = vmatprep.subr.msk.bf16.mxu0 %vm247_vm1, %v871_v4  ;;  %v866_v9 = vpop.permute.xlu0 %865  ;;  %v868_v10 = vpop.permute.xlu1 %867 }
  0xba   : > { %v873_v12 = vsel %vm869_vm6, %v864_v2, %v866_v9  ;;  %v874_v20 = vsel %vm869_vm6, %v866_v9, %v868_v10 }
  0xbb   : > { %3019 = vmatmul.mubr.msk.bf16.vlgmr.msra.gmra.mxu1 %vm243_vm2, %v3017_v5  ;;  %v891_v23 = vsel %vm247_vm1, %v874_v20, 0 }
  0xbc   : > { %3140 = vmatpush3.bf16.msra.mxu1 %v726_v8  ;;  %3141 = vmatprep.mubr.msk.bf16.mxu1 %vm3331_vm3, %v3330_v26 }
  0xbd   : > { %3026 = vmatprep.subr.msk.bf16.mxu1 %vm247_vm1, %v873_v12  ;;  %v1023_v14 = vpop.permute.xlu0 %1022  ;;  %v1025_v15 = vpop.permute.xlu1 %1024 }
  0xbe   : > { %v1035_v27 = vsel %vm4107_vm7, %v1023_v14, %v1025_v15 }
  0xbf   : > { %3021 = vmatmul.mubr.msk.bf16.vlgmr.msra.gmra.mxu0 %vm243_vm2, %v3017_v5  ;;  %v1044_v29 = vsel %vm247_vm1, %v1035_v27, 0 }
  0xc0   : > { %908 = vmatpush1.bf16.msra.mxu0 %v879_v13  ;;  %925 = vmatprep.mubr.bf16.mxu0 %v3320_v0 }
  0xc1   : > { %3145 = vmatprep.subr.bf16.mxu0 %v3330_v26  ;;  %v1027_v18 = vpop.permute.xlu0 %1026  ;;  %v1029_v19 = vpop.permute.xlu1 %1028 }
  0xc2   : > { %v1036_v21 = vsel %vm4107_vm7, %v1025_v15, %v1027_v18  ;;  %v1037_v32 = vsel %vm4107_vm7, %v1027_v18, %v1029_v19 }
  0xc3   : > { %3142 = vmatmul.mubr.msk.bf16.vlgmr.msra.gmra.mxu1 %vm243_vm2, %v3017_v5  ;;  %v1050_v33 = vsel %vm247_vm1, %v1037_v32, 0  ;;  %v3041_v5 = vld [vmem:[%s4100_s1 + $0xe] sm:$0x3] }
  0xc4   : > { %949 = vmatpush1.bf16.msra.mxu1 %v885_v17  ;;  %966 = vmatprep.mubr.bf16.mxu1 %v3320_v0  ;;  %v3047_v17 = vld [vmem:[%s4100_s1 + $0x10] sm:$0x3] }
  0xc5   : > { %3030 = vmatprep.subr.msk.bf16.mxu1 %vm247_vm1, %v1036_v21  ;;  %v1031_v24 = vpop.permute.xlu0 %1030  ;;  %v1033_v25 = vpop.permute.xlu1 %1032 }
  0xc6   : > { %v1038_v28 = vsel %vm4107_vm7, %v1029_v19, %v1031_v24  ;;  %v1039_v36 = vsel %vm4107_vm7, %v1031_v24, %v1033_v25 }
  0xc7   : > { %3025 = vmatmul.mubr.msk.bf16.vlgmr.msra.gmra.mxu0 %vm243_vm2, %v3023_v22  ;;  %v1056_v39 = vsel %vm247_vm1, %v1039_v36, 0 }
  0xc8   : > { %3146 = vmatpush3.bf16.msra.mxu0 %v891_v23  ;;  %3147 = vmatprep.mubr.msk.bf16.mxu0 %vm3331_vm3, %v3330_v26 }
  0xc9   : > { %3032 = vmatprep.subr.msk.bf16.mxu0 %vm247_vm1, %v1038_v28  ;;  %v1188_v30 = vpop.permute.xlu0 %1187  ;;  %v1190_v31 = vpop.permute.xlu1 %1189 }
  0xca   : > { %v1200_v42 = vsel %vm4106_vm8, %v1188_v30, %v1190_v31 }
  0xcb   : > { %3027 = vmatmul.mubr.msk.bf16.vlgmr.msra.gmra.mxu1 %vm243_vm2, %v3023_v22  ;;  %v1209_v44 = vsel %vm247_vm1, %v1200_v42, 0 }
  0xcc   : > { %1073 = vmatpush1.bf16.msra.mxu1 %v1044_v29  ;;  %1090 = vmatprep.mubr.bf16.mxu1 %v3320_v0 }
  0xcd   : > { %3151 = vmatprep.subr.bf16.mxu1 %v3330_v26  ;;  %v1192_v34 = vpop.permute.xlu0 %1191  ;;  %v1194_v35 = vpop.permute.xlu1 %1193 }
  0xce   : > { %v1201_v37 = vsel %vm4106_vm8, %v1190_v31, %v1192_v34  ;;  %v1202_v47 = vsel %vm4106_vm8, %v1192_v34, %v1194_v35 }
  0xcf   : > { %3148 = vmatmul.mubr.msk.bf16.vlgmr.msra.gmra.mxu0 %vm243_vm2, %v3023_v22  ;;  %v1215_v48 = vsel %vm247_vm1, %v1202_v47, 0 }
  0xd0   : > { %1114 = vmatpush1.bf16.msra.mxu0 %v1050_v33  ;;  %1131 = vmatprep.mubr.bf16.mxu0 %v3320_v0 }
  0xd1   : > { %3036 = vmatprep.subr.msk.bf16.mxu0 %vm247_vm1, %v1201_v37  ;;  %v1196_v40 = vpop.permute.xlu0 %1195  ;;  %v1198_v41 = vpop.permute.xlu1 %1197 }
  0xd2   : > { %v1203_v43 = vsel %vm4106_vm8, %v1194_v35, %v1196_v40  ;;  %v1204_v51 = vsel %vm4106_vm8, %v1196_v40, %v1198_v41 }
  0xd3   : > { %3031 = vmatmul.mubr.msk.bf16.vlgmr.msra.gmra.mxu1 %vm243_vm2, %v3029_v38  ;;  %v1221_v54 = vsel %vm247_vm1, %v1204_v51, 0 }
  0xd4   : > { %3152 = vmatpush3.bf16.msra.mxu1 %v1056_v39  ;;  %3153 = vmatprep.mubr.msk.bf16.mxu1 %vm3331_vm3, %v3330_v26 }
  0xd5   : > { %3038 = vmatprep.subr.msk.bf16.mxu1 %vm247_vm1, %v1203_v43  ;;  %v1353_v45 = vpop.permute.xlu0 %1352  ;;  %v1355_v46 = vpop.permute.xlu1 %1354 }
  0xd6   : > { %v1365_v57 = vsel %vm4105_vm9, %v1353_v45, %v1355_v46 }
  0xd7   : > { %3033 = vmatmul.mubr.msk.bf16.vlgmr.msra.gmra.mxu0 %vm243_vm2, %v3029_v38  ;;  %v1374_v59 = vsel %vm247_vm1, %v1365_v57, 0 }
  0xd8   : > { %1238 = vmatpush1.bf16.msra.mxu0 %v1209_v44  ;;  %1255 = vmatprep.mubr.bf16.mxu0 %v3320_v0 }
  0xd9   : > { %3157 = vmatprep.subr.bf16.mxu0 %v3330_v26  ;;  %v1357_v49 = vpop.permute.xlu0 %1356  ;;  %v1359_v50 = vpop.permute.xlu1 %1358 }
  0xda   : > { %v1366_v52 = vsel %vm4105_vm9, %v1355_v46, %v1357_v49  ;;  %v1367_v62 = vsel %vm4105_vm9, %v1357_v49, %v1359_v50 }
  0xdb   : > { %3154 = vmatmul.mubr.msk.bf16.vlgmr.msra.gmra.mxu1 %vm243_vm2, %v3029_v38  ;;  %v1380_v63 = vsel %vm247_vm1, %v1367_v62, 0 }
  0xdc   : > { %1279 = vmatpush1.bf16.msra.mxu1 %v1215_v48  ;;  %1296 = vmatprep.mubr.bf16.mxu1 %v3320_v0 }
  0xdd   : > { %3042 = vmatprep.subr.msk.bf16.mxu1 %vm247_vm1, %v1366_v52  ;;  %v1361_v55 = vpop.permute.xlu0 %1360  ;;  %v1363_v56 = vpop.permute.xlu1 %1362 }
  0xde   : > { %v1368_v58 = vsel %vm4105_vm9, %v1359_v50, %v1361_v55  ;;  %v1369_v2 = vsel %vm4105_vm9, %v1361_v55, %v1363_v56 }
  0xdf   : > { %3037 = vmatmul.mubr.msk.bf16.vlgmr.msra.gmra.mxu0 %vm243_vm2, %v3035_v53  ;;  %v1386_v8 = vsel %vm247_vm1, %v1369_v2, 0 }
  0xe0   : > { %3158 = vmatpush3.bf16.msra.mxu0 %v1221_v54  ;;  %3159 = vmatprep.mubr.msk.bf16.mxu0 %vm3331_vm3, %v3330_v26 }
  0xe1   : > { %3044 = vmatprep.subr.msk.bf16.mxu0 %vm247_vm1, %v1368_v58  ;;  %v1518_v60 = vpop.permute.xlu0 %1517  ;;  %v1520_v61 = vpop.permute.xlu1 %1519 }
  0xe2   : > { %v1530_v10 = vsel %vm4104_vm10, %v1518_v60, %v1520_v61 }
  0xe3   : > { %3039 = vmatmul.mubr.msk.bf16.vlgmr.msra.gmra.mxu1 %vm243_vm2, %v3035_v53  ;;  %v1539_v12 = vsel %vm247_vm1, %v1530_v10, 0 }
  0xe4   : > { %1403 = vmatpush1.bf16.msra.mxu1 %v1374_v59  ;;  %1420 = vmatprep.mubr.bf16.mxu1 %v3320_v0 }
  0xe5   : > { %3163 = vmatprep.subr.bf16.mxu1 %v3330_v26  ;;  %v1522_v1 = vpop.permute.xlu0 %1521  ;;  %v1524_v4 = vpop.permute.xlu1 %1523 }
  0xe6   : > { %v1531_v3 = vsel %vm4104_vm10, %v1520_v61, %v1522_v1  ;;  %v1532_v13 = vsel %vm4104_vm10, %v1522_v1, %v1524_v4 }
  0xe7   : > { %3160 = vmatmul.mubr.msk.bf16.vlgmr.msra.gmra.mxu0 %vm243_vm2, %v3035_v53  ;;  %v1545_v15 = vsel %vm247_vm1, %v1532_v13, 0 }
  0xe8   : > { %1444 = vmatpush1.bf16.msra.mxu0 %v1380_v63  ;;  %1461 = vmatprep.mubr.bf16.mxu0 %v3320_v0 }
  0xe9   : > { %3048 = vmatprep.subr.msk.bf16.mxu0 %vm247_vm1, %v1531_v3  ;;  %v1526_v9 = vpop.permute.xlu0 %1525  ;;  %v1528_v14 = vpop.permute.xlu1 %1527 }
  0xea   : > { %v1533_v11 = vsel %vm4104_vm10, %v1524_v4, %v1526_v9  ;;  %v1534_v16 = vsel %vm4104_vm10, %v1526_v9, %v1528_v14 }
  0xeb   : > { %3043 = vmatmul.mubr.msk.bf16.vlgmr.msra.gmra.mxu1 %vm243_vm2, %v3041_v5  ;;  %v1551_v18 = vsel %vm247_vm1, %v1534_v16, 0 }
  0xec   : > { %3164 = vmatpush3.bf16.msra.mxu1 %v1386_v8  ;;  %3165 = vmatprep.mubr.msk.bf16.mxu1 %vm3331_vm3, %v3330_v26 }
  0xed   : > { %3050 = vmatprep.subr.msk.bf16.mxu1 %vm247_vm1, %v1533_v11 }
  0xef   : > { %3045 = vmatmul.mubr.msk.bf16.vlgmr.msra.gmra.mxu0 %vm243_vm2, %v3041_v5 }
  0xf0   : > { %1568 = vmatpush1.bf16.msra.mxu0 %v1539_v12  ;;  %1585 = vmatprep.mubr.bf16.mxu0 %v3320_v0 }
  0xf1   : > { %3169 = vmatprep.subr.bf16.mxu0 %v3330_v26 }
  0xf3   : > { %3166 = vmatmul.mubr.msk.bf16.vlgmr.msra.gmra.mxu1 %vm243_vm2, %v3041_v5 }
  0xf4   : > { %1609 = vmatpush1.bf16.msra.mxu1 %v1545_v15  ;;  %1626 = vmatprep.mubr.bf16.mxu1 %v3320_v0 }
  0xf7   : > { %3049 = vmatmul.mubr.msk.bf16.vlgmr.msra.gmra.mxu0 %vm243_vm2, %v3047_v17 }
  0xf8   : > { %3170 = vmatpush3.bf16.msra.mxu0 %v1551_v18  ;;  %3171 = vmatprep.mubr.msk.bf16.mxu0 %vm3331_vm3, %v3330_v26 }
  0xfb   : > { %3051 = vmatmul.mubr.msk.bf16.vlgmr.msra.gmra.mxu1 %vm243_vm2, %v3047_v17 }
  0xfc   : > { %1869 = vmatprep.mubr.bf16.mxu1 %v3320_v0 }
  0xff   : > { %3172 = vmatmul.mubr.msk.bf16.vlgmr.msra.gmra.mxu0 %vm243_vm2, %v3047_v17 }
 0x100   : > { %1910 = vmatprep.mubr.bf16.mxu0 %v3320_v0 }
 0x157   : > { %v297_v19 = vpop.f32.mrf.mxu0 }
 0x159   : > { %v299_v20 = vpop.f32.mrf.mxu0 }
 0x15b   : > { %v301_v21 = vpop.f32.mrf.mxu0  ;;  %v338_v22 = vpop.f32.mrf.mxu1 }
 0x15d   : > { %v302_v23 = vpop.f32.mrf.mxu0  ;;  %v340_v24 = vpop.f32.mrf.mxu1 }
 0x15f   : > { %v342_v25 = vpop.f32.mrf.mxu1  ;;  %v379_v27 = vpop.f32.mrf.mxu0 }
 0x161   : > { %v343_v28 = vpop.f32.mrf.mxu1  ;;  %v3125_v29 = vpop.f32.mrf.mxu0 }
 0x163   : > { %v382_v30 = vpop.f32.mrf.mxu0  ;;  %v437_v26 = vpop.f32.mrf.mxu1 }
 0x164   : > { %v3719_v31 = vadd.f32 %v437_v26, %v297_v19 }
 0x165   : > { %v3126_v32 = vpop.f32.mrf.mxu0  ;;  %v439_v33 = vpop.f32.mrf.mxu1 }
 0x166   : > { %v440_v34 = vadd.f32 %v439_v33, %v299_v20 }
 0x167   : > { %v441_v35 = vpop.f32.mrf.mxu1  ;;  %v478_v36 = vpop.f32.mrf.mxu0 }
 0x168   : > { %v3721_v37 = vadd.f32 %v478_v36, %v338_v22 }
 0x169   : > { %v442_v38 = vpop.f32.mrf.mxu1  ;;  %v480_v39 = vpop.f32.mrf.mxu0 }
 0x16a   : > { %v481_v40 = vadd.f32 %v480_v39, %v340_v24 }
 0x16b   : > { %v482_v41 = vpop.f32.mrf.mxu0  ;;  %v519_v42 = vpop.f32.mrf.mxu1 }
 0x16c   : > { %v520_v43 = vadd.f32 %v519_v42, %v379_v27 }
 0x16d   : > { %v483_v44 = vpop.f32.mrf.mxu0  ;;  %v3131_v45 = vpop.f32.mrf.mxu1 }
 0x16f   : > { %v522_v46 = vpop.f32.mrf.mxu1  ;;  %v3723_v47 = vpop.f32.mrf.mxu0 }
 0x171   : > { %v3132_v48 = vpop.f32.mrf.mxu1  ;;  %v599_v49 = vpop.f32.mrf.mxu0 }
 0x172   : > { %v3725_v50 = vadd.f32 %v599_v49, %v440_v34 }
 0x173   : > { %v601_v51 = vpop.f32.mrf.mxu0  ;;  %v3727_v52 = vpop.f32.mrf.mxu1 }
 0x175   : > { %v602_v53 = vpop.f32.mrf.mxu0  ;;  %v640_v54 = vpop.f32.mrf.mxu1 }
 0x176   : > { %v3729_v55 = vadd.f32 %v640_v54, %v481_v40 }
 0x177   : > { %v642_v56 = vpop.f32.mrf.mxu1  ;;  %v679_v57 = vpop.f32.mrf.mxu0 }
 0x178   : > { %v3731_v58 = vadd.f32 %v679_v57, %v520_v43  ;;  %v685_v56 = vadd.f32 %v3723_v47, %v3719_v31 }
 0x179   : > { %v643_v59 = vpop.f32.mrf.mxu1  ;;  %v3137_v60 = vpop.f32.mrf.mxu0 }
 0x17b   : > { %v682_v61 = vpop.f32.mrf.mxu0  ;;  %v762_v62 = vpop.f32.mrf.mxu1 }
 0x17c   : > { %v850_v60 = vadd.f32 %v762_v62, %v685_v56 }
 0x17d   : > { %v3138_v63 = vpop.f32.mrf.mxu0  ;;  %v764_v1 = vpop.f32.mrf.mxu1 }
 0x17f   : > { %v766_v2 = vpop.f32.mrf.mxu1  ;;  %v803_v3 = vpop.f32.mrf.mxu0 }
 0x180   : > { %v687_v2 = vadd.f32 %v3727_v52, %v3721_v37  ;;  %v1683_v52 = vpop.permute.xlu0 %1682 }
 0x181   : > { %v767_v4 = vpop.f32.mrf.mxu1  ;;  %v805_v5 = vpop.f32.mrf.mxu0 }
 0x182   : > { %v851_v4 = vadd.f32 %v764_v1, %v3725_v50  ;;  %v853_v62 = vadd.f32 %v805_v5, %v3729_v55 }
 0x183   : > { %v807_v8 = vpop.f32.mrf.mxu0  ;;  %v3733_v9 = vpop.f32.mrf.mxu1 }
 0x184   : > { %v854_v50 = vadd.f32 %v3733_v9, %v3731_v58 }
 0x185   : > { %v808_v10 = vpop.f32.mrf.mxu0  ;;  %v3143_v11 = vpop.f32.mrf.mxu1 }
 0x187   : > { %v847_v12 = vpop.f32.mrf.mxu1  ;;  %v927_v13 = vpop.f32.mrf.mxu0 }
 0x188   : > { %v1015_v8 = vadd.f32 %v927_v13, %v850_v60  ;;  %v852_v12 = vadd.f32 %v803_v3, %v687_v2 }
 0x189   : > { %v3144_v14 = vpop.f32.mrf.mxu1  ;;  %v929_v15 = vpop.f32.mrf.mxu0 }
 0x18a   : > { %v1016_v14 = vadd.f32 %v929_v15, %v851_v4 }
 0x18b   : > { %v931_v16 = vpop.f32.mrf.mxu0  ;;  %v968_v17 = vpop.f32.mrf.mxu1 }
 0x18d   : > { %v932_v18 = vpop.f32.mrf.mxu0  ;;  %v970_v19 = vpop.f32.mrf.mxu1 }
 0x18e   : > { %v1018_v1 = vadd.f32 %v970_v19, %v853_v62 }
 0x18f   : > { %v972_v20 = vpop.f32.mrf.mxu1  ;;  %v3735_v21 = vpop.f32.mrf.mxu0 }
 0x191   : > { %v973_v22 = vpop.f32.mrf.mxu1  ;;  %v3149_v23 = vpop.f32.mrf.mxu0 }
 0x192   : > { %v1017_v22 = vadd.f32 %v968_v17, %v852_v12  ;;  %v1692_v17 = vpop.permute.xlu1 %1691 }
 0x193   : > { %v1012_v24 = vpop.f32.mrf.mxu0  ;;  %v1092_v25 = vpop.f32.mrf.mxu1 }
 0x194   : > { %v1180_v16 = vadd.f32 %v1092_v25, %v1015_v8 }
 0x195   : > { %v3150_v27 = vpop.f32.mrf.mxu0  ;;  %v1094_v28 = vpop.f32.mrf.mxu1 }
 0x196   : > { %v1181_v31 = vadd.f32 %v1094_v28, %v1016_v14  ;;  %v1019_v28 = vadd.f32 %v3735_v21, %v854_v50 }
 0x197   : > { %v1096_v29 = vpop.f32.mrf.mxu1  ;;  %v1133_v30 = vpop.f32.mrf.mxu0 }
 0x198   : > { %v1182_v27 = vadd.f32 %v1133_v30, %v1017_v22 }
 0x199   : > { %v1097_v26 = vpop.f32.mrf.mxu1  ;;  %v1135_v32 = vpop.f32.mrf.mxu0 }
 0x19b   : > { %v1137_v33 = vpop.f32.mrf.mxu0  ;;  %v1174_v34 = vpop.f32.mrf.mxu1 }
 0x19c   : > { %v1183_v33 = vadd.f32 %v1135_v32, %v1018_v1 }
 0x19d   : > { %v1138_v35 = vpop.f32.mrf.mxu0  ;;  %v3155_v36 = vpop.f32.mrf.mxu1 }
 0x19f   : > { %v1177_v38 = vpop.f32.mrf.mxu1  ;;  %v1257_v39 = vpop.f32.mrf.mxu0 }
 0x1a0   : > { %v1345_v47 = vadd.f32 %v1257_v39, %v1180_v16  ;;  %v1184_v38 = vadd.f32 %v1174_v34, %v1019_v28 }
 0x1a1   : > { %v3156_v40 = vpop.f32.mrf.mxu1  ;;  %v1259_v41 = vpop.f32.mrf.mxu0 }
 0x1a2   : > { %v1346_v29 = vadd.f32 %v1259_v41, %v1181_v31 }
 0x1a3   : > { %v1261_v42 = vpop.f32.mrf.mxu0  ;;  %v1298_v43 = vpop.f32.mrf.mxu1 }
 0x1a4   : > { %v1347_v15 = vadd.f32 %v1298_v43, %v1182_v27 }
 0x1a5   : > { %v1262_v44 = vpop.f32.mrf.mxu0  ;;  %v1300_v45 = vpop.f32.mrf.mxu1 }
 0x1a6   : > { %v1348_v39 = vadd.f32 %v1300_v45, %v1183_v33 }
 0x1a7   : > { %v1302_v46 = vpop.f32.mrf.mxu1  ;;  %v1339_v48 = vpop.f32.mrf.mxu0 }
 0x1a8   : > { %v1349_v42 = vadd.f32 %v1339_v48, %v1184_v38 }
 0x1a9   : > { %v1303_v49 = vpop.f32.mrf.mxu1  ;;  %v3161_v51 = vpop.f32.mrf.mxu0 }
 0x1ab   : > { %v1342_v53 = vpop.f32.mrf.mxu0  ;;  %v1422_v54 = vpop.f32.mrf.mxu1 }
 0x1ac   : > { %v1510_v37 = vadd.f32 %v1422_v54, %v1345_v47 }
 0x1ad   : > { %v3162_v57 = vpop.f32.mrf.mxu0  ;;  %v1424_v59 = vpop.f32.mrf.mxu1 }
 0x1ae   : > { %v1511_v25 = vadd.f32 %v1424_v59, %v1346_v29 }
 0x1af   : > { %v1426_v61 = vpop.f32.mrf.mxu1  ;;  %v1463_v63 = vpop.f32.mrf.mxu0 }
 0x1b0   : > { %v1512_v35 = vadd.f32 %v1463_v63, %v1347_v15 }
 0x1b1   : > { %v1427_v10 = vpop.f32.mrf.mxu1  ;;  %v1465_v11 = vpop.f32.mrf.mxu0 }
 0x1b2   : > { %v1513_v43 = vadd.f32 %v1465_v11, %v1348_v39 }
 0x1b3   : > { %v1467_v18 = vpop.f32.mrf.mxu0  ;;  %v1504_v20 = vpop.f32.mrf.mxu1 }
 0x1b4   : > { %v1514_v51 = vadd.f32 %v1504_v20, %v1349_v42  ;;  %v1744_v18 = vlaneseq }
 0x1b5   : > { %v1468_v23 = vpop.f32.mrf.mxu0  ;;  %v3167_v24 = vpop.f32.mrf.mxu1 }
 0x1b7   : > { %v1507_v3 = vpop.f32.mrf.mxu1  ;;  %v1587_v13 = vpop.f32.mrf.mxu0 }
 0x1b8   : > { %v1675_v26 = vadd.f32 %v1587_v13, %v1510_v37 }
 0x1b9   : > { %v3168_v55 = vpop.f32.mrf.mxu1  ;;  %v1589_v5 = vpop.f32.mrf.mxu0 }
 0x1ba   : > { %v1676_v30 = vadd.f32 %v1589_v5, %v1511_v25  ;;  %v1685_v36 = vmul.f32 %v1683_v52, %v1675_v26 }
 0x1bb   : > { %v1591_v40 = vpop.f32.mrf.mxu0  ;;  %v1628_v41 = vpop.f32.mrf.mxu1 }
 0x1bc   : > { %v1686_v58 = vmul.f32 %v1683_v52, %v1676_v30  ;;  %v3746_v9 = vadd.f32 %v1692_v17, %v1685_v36  ;;  %v1677_v19 = vadd.f32 %v1628_v41, %v1512_v35 }
 0x1bd   : > { %v1592_v44 = vpop.f32.mrf.mxu0  ;;  %v1630_v46 = vpop.f32.mrf.mxu1 }
 0x1be   : > { %v3748_v49 = vadd.f32 %v1692_v17, %v1686_v58  ;;  %v1704_v21 = vmul.f32 0.044715, %v3746_v9  ;;  %v1687_v32 = vmul.f32 %v1683_v52, %v1677_v19  ;;  %v1678_v53 = vadd.f32 %v1630_v46, %v1513_v43 }
 0x1bf   : > { %v1632_v54 = vpop.f32.mrf.mxu1  ;;  %v1669_v34 = vpop.f32.mrf.mxu0  ;;  %v1699_v41 = vmul.f32 0.5, %v3746_v9 }
 0x1c0   : > { %v1705_v45 = vmul.f32 0.044715, %v3748_v49  ;;  %v1709_v56 = vmul.f32 %v1704_v21, %v3746_v9  ;;  %v3753_v57 = vadd.f32 %v1692_v17, %v1687_v32  ;;  %v1688_v59 = vmul.f32 %v1683_v52, %v1678_v53 }
 0x1c1   : > { %v1679_v48 = vadd.f32 %v1669_v34, %v1514_v51  ;;  %v1633_v60 = vpop.f32.mrf.mxu1  ;;  %v3173_v61 = vpop.f32.mrf.mxu0  ;;  %v1700_v54 = vmul.f32 0.5, %v3748_v49  ;;  %v3062_v51 = vld [vmem:[%s4101_s2 + $0x4] sm:$0x3] }
 0x1c2   : > { %v1710_v63 = vmul.f32 %v1705_v45, %v3748_v49  ;;  %v1714_v2 = vmul.f32 %v1709_v56, %v3746_v9  ;;  %v1706_v4 = vmul.f32 0.044715, %v3753_v57  ;;  %v3758_v8 = vadd.f32 %v1692_v17, %v1688_v59 }
 0x1c3   : > { %v1689_v10 = vmul.f32 %v1683_v52, %v1679_v48  ;;  %v1672_v11 = vpop.f32.mrf.mxu0  ;;  %v1745_v52 = vand.u32 127, %v1744_v18  ;;  %v1701_v45 = vmul.f32 0.5, %v3753_v57 }
 0x1c4   : > { %v1715_v12 = vmul.f32 %v1710_v63, %v3748_v49  ;;  %v1719_v14 = vadd.f32 %v1714_v2, %v3746_v9  ;;  %v1711_v16 = vmul.f32 %v1706_v4, %v3753_v57  ;;  %v1707_v20 = vmul.f32 0.044715, %v3758_v8 }
 0x1c5   : > { %v3764_v22 = vadd.f32 %v1692_v17, %v1689_v10  ;;  %v3174_v31 = vpop.f32.mrf.mxu0  ;;  %v1750_v25 = vand.u32 31, %v1745_v52  ;;  %v1747_v33 = vadd.s32 256, %v1745_v52  ;;  %v1746_v55 = vadd.s32 128, %v1745_v52 }
 0x1c6   : > { %v1720_v47 = vadd.f32 %v1715_v12, %v3748_v49  ;;  %v1724_v62 = vmul.f32 0.7978846, %v1719_v14  ;;  %v1716_v23 = vmul.f32 %v1711_v16, %v3753_v57  ;;  %v1712_v24 = vmul.f32 %v1707_v20, %v3758_v8 }
 0x1c7   : > { %v1708_v27 = vmul.f32 0.044715, %v3764_v22  ;;  %vm1755_vm11 = vcmp.ge.s32.totalorder %v1745_v52, 32  ;;  %vm1770_vm12 = vcmp.ge.s32.totalorder %v1750_v25, 1  ;;  %v1749_v5 = vadd.s32 512, %v1745_v52 }
 0x1c8   : > { %v1725_v29 = vmul.f32 0.7978846, %v1720_v47  ;;  %3236 = vtanh.f32 %v1724_v62  ;;  %v1721_v37 = vadd.f32 %v1716_v23, %v3753_v57  ;;  %v1717_v50 = vmul.f32 %v1712_v24, %v3758_v8  ;;  %vm3776_vm13 = vmand %vm1755_vm11, %vm1770_vm12  ;;  %v3067_v57 = vld [vmem:[%s4101_s2 + $0x6] sm:$0x3] }
 0x1c9   : > { %v1713_v1 = vmul.f32 %v1708_v27, %v3764_v22  ;;  %vm3780_vm14 = vcmp.le.s32.totalorder %v1750_v25, 16  ;;  %v1752_v36 = vand.u32 31, %v1747_v33  ;;  %v1751_v39 = vand.u32 31, %v1746_v55  ;;  %v3254_v27 = vld [vmem:[%s4102_s3] sm:$0xf] }
 0x1ca   : > { %3238 = vtanh.f32 %v1725_v29  ;;  %v1726_v3 = vmul.f32 0.7978846, %v1721_v37  ;;  %v1722_v13 = vadd.f32 %v1717_v50, %v3758_v8  ;;  %v1748_v40 = vadd.s32 384, %v1745_v52  ;;  %vm1785_vm15 = vmand %vm3776_vm13, %vm3780_vm14  ;;  %v3255_v29 = vld [vmem:[%s3415_s5] sm:$0xff]  ;;  %v3256_v37 = vld [vmem:[%s3415_s5 + $0x8] sm:$0xff] }
 0x1cb   : > { %v1718_v15 = vmul.f32 %v1713_v1, %v3764_v22  ;;  %v1754_v42 = vand.u32 31, %v1749_v5  ;;  %vm3789_vm3 = vcmp.ge.s32.totalorder %v1752_v36, 1  ;;  %vm3793_vm11 = vcmp.le.s32.totalorder %v1752_v36, 16  ;;  %v3257_v52 = vld [vmem:[%s3415_s5 + $0x10] sm:$0xff] }
 0x1cc   : > { %3240 = vtanh.f32 %v1726_v3  ;;  %v1727_v26 = vmul.f32 0.7978846, %v1722_v13  ;;  %vm3797_vm12 = vcmp.ge.s32.totalorder %v1751_v39, 1  ;;  %vm3801_vm10 = vcmp.le.s32.totalorder %v1751_v39, 16  ;;  %vm1787_vm13 = vmand %vm3789_vm3, %vm3793_vm11 }
 0x1cd   : > { %v1723_v17 = vadd.f32 %v1718_v15, %v3764_v22  ;;  %v1753_v53 = vand.u32 31, %v1748_v40  ;;  %vm1764_vm14 = vcmp.lt.s32.totalorder %v1749_v5, 544  ;;  %vm1774_vm9 = vcmp.ge.s32.totalorder %v1754_v42, 1 }
 0x1ce   : > { %3242 = vtanh.f32 %v1727_v26  ;;  %v1702_v10 = vmul.f32 0.5, %v3758_v8  ;;  %vm1784_vm3 = vcmp.le.s32.totalorder %v1754_v42, 16  ;;  %v1703_v12 = vmul.f32 0.5, %v3764_v22 }
 0x1cf   : > { %v1728_v28 = vmul.f32 0.7978846, %v1723_v17  ;;  %vm3817_vm8 = vcmp.ge.s32.totalorder %v1753_v53, 1  ;;  %vm3821_vm7 = vcmp.le.s32.totalorder %v1753_v53, 16  ;;  %v3332_v23 = vmov 2  }
 0x1d0   : > { %vm1788_vm11 = vmand %vm3817_vm8, %vm3821_vm7  ;;  %3231 = vset.pattern.permute.xlu1 %v3332_v23  ;;  %v3333_v24 = vmov 3  }
 0x1d1   : > { %3244 = vtanh.f32 %v1728_v28  ;;  %3232 = vset.pattern.permute.xlu0 %v3333_v24 }
 0x1d5   : > { %v3237_v38 = vpop.eup %3236 }
 0x1d6   : > { %v1734_v58 = vadd.f32 1.0, %v3237_v38 }
 0x1d7   : > { %v3239_v19 = vpop.eup %3238 }
 0x1d8   : > { %v1735_v43 = vadd.f32 1.0, %v3239_v19  ;;  %v1739_v44 = vmul.f32 %v1734_v58, %v1699_v41  ;;  %v1800_v58 = vld [vmem:[%s4101_s2] sm:$0x3] }
 0x1d9   : > { %v3241_v32 = vpop.eup %3240 }
 0x1da   : > { %v1790_v34 = vsel %vm1785_vm15, %v1739_v44, 0.0  ;;  %v1736_v56 = vadd.f32 1.0, %v3241_v32  ;;  %v1740_v60 = vmul.f32 %v1735_v43, %v1700_v54  ;;  %vm1786_vm15 = vmand %vm3797_vm12, %vm3801_vm10 }
 0x1db   : > { %v3807_v59 = vpack.c.bf16 %v1790_v34, %v1790_v34  ;;  %v3243_v48 = vpop.eup %3242  ;;  %vm1779_vm10 = vmand %vm1764_vm14, %vm1774_vm9  ;;  %vm4134_vm14 = vcmask 515072  }
 0x1dc   : > { %v1741_v61 = vmul.f32 %v1736_v56, %v1701_v45  ;;  %v1737_v49 = vadd.f32 1.0, %v3243_v48  ;;  %v1791_v16 = vsel %vm1786_vm15, %v1740_v60, 0.0  ;;  %vm1789_vm12 = vmand %vm1779_vm10, %vm1784_vm3 }
 0x1dd   : > { %2018 = vrot.lane.b32.xlu0 %v3807_v59, %s3322_s7  ;;  %1808 = vrot.lane.b32.xlu1 %v3807_v59, %s3321_s6  ;;  %v3841_v8 = vpack.c.bf16 %v1791_v16, %v1791_v16  ;;  %v1923_v30 = vsel %vm247_vm1, %v3807_v59, 0  ;;  %vm4135_vm15 = vmmov %vm4134_vm14 }
 0x1de   : > { %v3245_v2 = vpop.eup %3244  ;;  %v1792_v4 = vsel %vm1787_vm13, %v1741_v61, 0.0  ;;  %v1742_v18 = vmul.f32 %v1737_v49, %v1702_v10  ;;  %vm4136_vm10 = vmmov %vm4134_vm14 }
 0x1df   : > { %v3830_v11 = vpack.c.bf16 %v1792_v4, %v1792_v4  ;;  %v1738_v14 = vadd.f32 1.0, %v3245_v2  ;;  %vm4137_vm3 = vmmov %vm4136_vm10 }
 0x1e0   : > { %v1793_v31 = vsel %vm1788_vm11, %v1742_v18, 0.0  ;;  %v3072_v18 = vld [vmem:[%s4101_s2 + $0x8] sm:$0x3]  ;;  %vm4138_vm11 = vcmask 506880  }
 0x1e1   : > { %v1743_v20 = vmul.f32 %v1738_v14, %v1703_v12  ;;  %2022 = vrot.lane.b32.xlu0 %v3830_v11, %s3322_s7  ;;  %1812 = vrot.lane.b32.xlu1 %v3830_v11, %s3321_s6  ;;  %v3847_v47 = vpack.c.bf16 %v1793_v31, %v1793_v31  ;;  %v1929_v40 = vsel %vm247_vm1, %v3830_v11, 0 }
 0x1e3   : > { %v1794_v22 = vsel %vm1789_vm12, %v1743_v20, 0.0  ;;  %vm4139_vm12 = vmmov %vm4138_vm11 }
 0x1e4   : > { %v1799_v62 = vpack.c.bf16 %v1794_v22, %v1794_v22 }
 0x1e5   : > { %1810 = vrot.lane.b32.xlu0 %v3841_v8, %s3321_s6  ;;  %2020 = vrot.lane.b32.xlu1 %v3841_v8, %s3322_s7 }
 0x1e9   : > { %1814 = vrot.lane.b32.xlu0 %v3847_v47, %s3321_s6  ;;  %1816 = vrot.lane.b32.xlu1 %v1799_v62, %s3321_s6 }
 0x1ed   : > { %2137 = vrot.lane.b32.xlu0 %v3841_v8, %s3323_s8  ;;  %2024 = vrot.lane.b32.xlu1 %v3847_v47, %s3322_s7 }
 0x1f1   : > { %2141 = vrot.lane.b32.xlu0 %v3847_v47, %s3323_s8  ;;  %2135 = vrot.lane.b32.xlu1 %v3807_v59, %s3323_s8 }
 0x1f5   : > { %2252 = vrot.lane.b32.xlu0 %v3807_v59, %s3324_s9  ;;  %2139 = vrot.lane.b32.xlu1 %v3830_v11, %s3323_s8 }
 0x1f9   : > { %2026 = vrot.lane.b32.xlu0 %v1799_v62, %s3322_s7  ;;  %2254 = vrot.lane.b32.xlu1 %v3841_v8, %s3324_s9 }
 0x1fd   : > { %2256 = vrot.lane.b32.xlu0 %v3830_v11, %s3324_s9  ;;  %2258 = vrot.lane.b32.xlu1 %v3847_v47, %s3324_s9 }
 0x201   : > { %2371 = vrot.lane.b32.xlu0 %v3841_v8, %s3325_s10  ;;  %2143 = vrot.lane.b32.xlu1 %v1799_v62, %s3323_s8  ;;  %s188_s8 = sand.u32 1, %s3310_s16  }
 0x202   : > { %s2921_s29 = scalar_lea.sflag [#allocation3], %s188_s8 }
 0x205   : > { %2375 = vrot.lane.b32.xlu0 %v3847_v47, %s3325_s10  ;;  %2369 = vrot.lane.b32.xlu1 %v3807_v59, %s3325_s10 }
 0x209   : > { %2260 = vrot.lane.b32.xlu0 %v1799_v62, %s3324_s9  ;;  %2373 = vrot.lane.b32.xlu1 %v3830_v11, %s3325_s10  ;;  %s2998_s9 = sshll.u32 %s188_s8, 4 }
 0x20d   : > { %2486 = vrot.lane.b32.xlu0 %v3807_v59, %s3326_s11  ;;  %2488 = vrot.lane.b32.xlu1 %v3841_v8, %s3326_s11 }
 0x211   : > { %2490 = vrot.lane.b32.xlu0 %v3830_v11, %s3326_s11  ;;  %2377 = vrot.lane.b32.xlu1 %v1799_v62, %s3325_s10  ;;  %s3102_s10 = sshll.u32 %s3381_s19, 8  ;;  %s3262_s19 = sshll.u32 %s3334_s14, 4  ;;  %s3263_s19 = int_to_ptr.vmem [resolvable:$false] %s3262_s19 }
 0x212   : > { %s2933_s28 = scalar_lea.hbm %s4103_s4, %s3102_s10  ;;  %s3264_s20 = scalar_lea.vmem %s3263_s19, 512 }
 0x215   : > { %2605 = vrot.lane.b32.xlu0 %v3841_v8, %s3327_s12  ;;  %2492 = vrot.lane.b32.xlu1 %v3847_v47, %s3326_s11 }
 0x219   : > { %2494 = vrot.lane.b32.xlu0 %v1799_v62, %s3326_s11  ;;  %2603 = vrot.lane.b32.xlu1 %v3807_v59, %s3327_s12  ;;  %s190_s11 = scalar_lea.vmem [#allocation2], %s2998_s9 }
 0x21d   : > { %2609 = vrot.lane.b32.xlu0 %v3847_v47, %s3327_s12  ;;  %2607 = vrot.lane.b32.xlu1 %v3830_v11, %s3327_s12 }
 0x221   : > { %2720 = vrot.lane.b32.xlu0 %v3807_v59, %s3328_s13  ;;  %2611 = vrot.lane.b32.xlu1 %v1799_v62, %s3327_s12  ;;  %s2935_s12 = sshll.u32 %s190_s11, 4  ;;  %s2936_s12 = int_to_ptr.vmem [resolvable:$true] %s2935_s12 }
 0x222   : > { %s3258_s30 = scalar_lea.vmem %s2936_s12, 256  ;;  %p3265_p0 = scmp.lt.s32.totalorder %s2936_s12, %s3263_s19 }
 0x223   : > { %p3259_p11 = scmp.ne.s32.totalorder %s2936_s12, %s3258_s30  ;;  %p3266_p1 = scmp.lt.s32.totalorder %s3264_s20, %s3258_s30 }
 0x225   : > { %2724 = vrot.lane.b32.xlu0 %v3830_v11, %s3328_s13  ;;  %2722 = vrot.lane.b32.xlu1 %v3841_v8, %s3328_s13  ;;  %p3260_p12 = pnand %p3259_p11, %p3398_p5  ;;  %p3267_p2 = por %p3266_p1, %p3265_p0 }
 0x227   : > { %p3261_p13 = pneg %p3260_p12 }
 0x229   : > { %2728 = vrot.lane.b32.xlu0 %v1799_v62, %s3328_s13  ;;  %2726 = vrot.lane.b32.xlu1 %v3847_v47, %s3328_s13  ;;  %p3268_p3 = pnand %p3267_p2, %p3261_p13 }
 0x22d   : > { %2836 = vperm.xlu1 %3231, %v3254_v27   ;;  %2844 = vperm.xlu0 %3232, %v3254_v27  }
 0x231   : > { %2851 = vrot.lane.b32.xlu1 %v3255_v29, %s3328_s13  ;;  %2855 = vrot.lane.b32.xlu0 %v3256_v37, %s3328_s13  ;;  %v3077_v37 = vld [vmem:[%s4101_s2 + $0xa] sm:$0x3] }
 0x235   : > { %2853 = vrot.lane.b32.xlu1 %v3427_v7, %s3328_s13  ;;  %2859 = vrot.lane.b32.xlu0 %v3257_v52, %s3328_s13  ;;  %v3053_v7 = vld [vmem:[%s4101_s2 + $0x2] sm:$0x3] }
 0x239   : > { %2857 = vrot.lane.b32.xlu1 %v3425_v6, %s3328_s13 }
 0x24f   : > { %v2019_v50 = vpop.permute.xlu0 %2018  ;;  %v1809_v1 = vpop.permute.xlu1 %1808 }
 0x253   : > { %v2023_v3 = vpop.permute.xlu0 %2022  ;;  %v1813_v13 = vpop.permute.xlu1 %1812 }
 0x257   : > { %v1811_v15 = vpop.permute.xlu0 %1810  ;;  %v2021_v25 = vpop.permute.xlu1 %2020 }
 0x258   : > { %v1818_v26 = vsel %vm237_vm0, %v1809_v1, %v1811_v15  ;;  %v1819_v17 = vsel %vm237_vm0, %v1811_v15, %v1813_v13  ;;  %v2029_v36 = vsel %vm539_vm4, %v2021_v25, %v2023_v3  ;;  %v2028_v41 = vsel %vm539_vm4, %v2019_v50, %v2021_v25 }
 0x259   : > { %v1826_v28 = vsel %vm247_vm1, %v1818_v26, 0  ;;  %3054 = vmatprep.subr.msk.bf16.mxu1 %vm247_vm1, %v1819_v17  ;;  %v2036_v43 = vsel %vm247_vm1, %v2028_v41, 0  ;;  %v3087_v41 = vld [vmem:[%s4101_s2 + $0xe] sm:$0x3] }
 0x25a   : > { %1852 = vmatpush1.bf16.msra.mxu1 %v1826_v28 }
 0x25b   : > { %v1815_v6 = vpop.permute.xlu0 %1814  ;;  %3058 = vmatprep.subr.msk.bf16.mxu1 %vm247_vm1, %v3841_v8  ;;  %v1817_v33 = vpop.permute.xlu1 %1816 }
 0x25c   : > { %v1820_v55 = vsel %vm237_vm0, %v1813_v13, %v1815_v6  ;;  %v1821_v5 = vsel %vm237_vm0, %v1815_v6, %v1817_v33  ;;  %vm4126_vm0 = vcmask 769024  }
 0x25d   : > { %v1832_v35 = vsel %vm247_vm1, %v1820_v55, 0  ;;  %3055 = vmatmul.mubr.msk.bf16.vlgmr.msra.gmra.mxu1 %vm243_vm2, %v3053_v7  ;;  %3056 = vmatprep.subr.msk.bf16.mxu0 %vm247_vm1, %v1821_v5  ;;  %vm4131_vm8 = vmmov %vm4126_vm0 }
 0x25e   : > { %1893 = vmatpush1.bf16.msra.mxu0 %v1832_v35  ;;  %1949 = vmatpush1.bf16.msra.mxu1 %v1923_v30 }
 0x25f   : > { %v2138_v38 = vpop.permute.xlu0 %2137  ;;  %3060 = vmatprep.subr.msk.bf16.mxu0 %vm247_vm1, %v3847_v47  ;;  %v2025_v39 = vpop.permute.xlu1 %2024  ;;  %3063 = vmatprep.subr.msk.bf16.mxu1 %vm247_vm1, %v2029_v36 }
 0x260   : > { %1966 = vmatprep.mubr.bf16.mxu1 %v3320_v0  ;;  %v2030_v32 = vsel %vm539_vm4, %v2023_v3, %v2025_v39 }
 0x261   : > { %3057 = vmatmul.mubr.msk.bf16.vlgmr.msra.gmra.mxu0 %vm243_vm2, %v3053_v7  ;;  %v2042_v45 = vsel %vm247_vm1, %v2030_v32, 0  ;;  %v3082_v7 = vld [vmem:[%s4101_s2 + $0xc] sm:$0x3] }
 0x262   : > { %1990 = vmatpush1.bf16.msra.mxu0 %v1929_v40  ;;  %2007 = vmatprep.mubr.bf16.mxu0 %v3320_v0 }
 0x263   : > { %v2142_v19 = vpop.permute.xlu0 %2141  ;;  %v2136_v42 = vpop.permute.xlu1 %2135 }
 0x264   : > { %v2145_v9 = vsel %vm704_vm5, %v2136_v42, %v2138_v38 }
 0x265   : > { %3059 = vmatmul.mubr.msk.bf16.vlgmr.msra.gmra.mxu1 %vm243_vm2, %v1800_v58  ;;  %v2153_v56 = vsel %vm247_vm1, %v2145_v9, 0 }
 0x266   : > { %2062 = vmatpush1.bf16.msra.mxu1 %v2036_v43  ;;  %2079 = vmatprep.mubr.bf16.mxu1 %v3320_v0 }
 0x267   : > { %v2253_v44 = vpop.permute.xlu0 %2252  ;;  %v2140_v46 = vpop.permute.xlu1 %2139 }
 0x268   : > { %v2146_v21 = vsel %vm704_vm5, %v2138_v38, %v2140_v46  ;;  %v2147_v61 = vsel %vm704_vm5, %v2140_v46, %v2142_v19 }
 0x269   : > { %3061 = vmatmul.mubr.msk.bf16.vlgmr.msra.gmra.mxu0 %vm243_vm2, %v1800_v58  ;;  %3068 = vmatprep.subr.msk.bf16.mxu1 %vm247_vm1, %v2146_v21  ;;  %v2159_v10 = vsel %vm247_vm1, %v2147_v61, 0 }
 0x26a   : > { %2120 = vmatprep.mubr.bf16.mxu0 %v3320_v0 }
 0x26b   : > { %v2027_v53 = vpop.permute.xlu0 %2026  ;;  %v2255_v54 = vpop.permute.xlu1 %2254 }
 0x26c   : > { %v2031_v34 = vsel %vm539_vm4, %v2025_v39, %v2027_v53  ;;  %v2262_v49 = vsel %vm869_vm6, %v2253_v44, %v2255_v54  ;;  %vm4127_vm4 = vmmov %vm4126_vm0 }
 0x26d   : > { %3064 = vmatmul.mubr.msk.bf16.vlgmr.msra.gmra.mxu1 %vm243_vm2, %v3062_v51  ;;  %3065 = vmatprep.subr.msk.bf16.mxu0 %vm247_vm1, %v2031_v34  ;;  %v2270_v11 = vsel %vm247_vm1, %v2262_v49, 0 }
 0x26e   : > { %2179 = vmatpush1.bf16.msra.mxu1 %v2153_v56  ;;  %2103 = vmatpush1.bf16.msra.mxu0 %v2042_v45 }
 0x26f   : > { %v2257_v59 = vpop.permute.xlu0 %2256  ;;  %v2259_v48 = vpop.permute.xlu1 %2258  ;;  %2196 = vmatprep.mubr.bf16.mxu1 %v3320_v0 }
 0x270   : > { %v2263_v60 = vsel %vm869_vm6, %v2255_v54, %v2257_v59  ;;  %v2264_v16 = vsel %vm869_vm6, %v2257_v59, %v2259_v48 }
 0x271   : > { %3066 = vmatmul.mubr.msk.bf16.vlgmr.msra.gmra.mxu0 %vm243_vm2, %v3062_v51  ;;  %3073 = vmatprep.subr.msk.bf16.mxu1 %vm247_vm1, %v2263_v60  ;;  %v2276_v62 = vsel %vm247_vm1, %v2264_v16, 0  ;;  %v3092_v51 = vld [vmem:[%s4101_s2 + $0x10] sm:$0x3] }
 0x272   : > { %2237 = vmatprep.mubr.bf16.mxu0 %v3320_v0 }
 0x273   : > { %v2372_v63 = vpop.permute.xlu0 %2371  ;;  %v2144_v2 = vpop.permute.xlu1 %2143 }
 0x274   : > { %v2148_v4 = vsel %vm704_vm5, %v2142_v19, %v2144_v2  ;;  %vm4128_vm5 = vmmov %vm4126_vm0 }
 0x275   : > { %3069 = vmatmul.mubr.msk.bf16.vlgmr.msra.gmra.mxu1 %vm243_vm2, %v3067_v57  ;;  %3070 = vmatprep.subr.msk.bf16.mxu0 %vm247_vm1, %v2148_v4 }
 0x276   : > { %2296 = vmatpush1.bf16.msra.mxu1 %v2270_v11  ;;  %2220 = vmatpush1.bf16.msra.mxu0 %v2159_v10 }
 0x277   : > { %v2376_v12 = vpop.permute.xlu0 %2375  ;;  %v2370_v14 = vpop.permute.xlu1 %2369  ;;  %2313 = vmatprep.mubr.bf16.mxu1 %v3320_v0 }
 0x278   : > { %v2379_v20 = vsel %vm4126_vm0, %v2370_v14, %v2372_v63  ;;  %vm4140_vm0 = vmmov %vm4138_vm11 }
 0x279   : > { %3071 = vmatmul.mubr.msk.bf16.vlgmr.msra.gmra.mxu0 %vm243_vm2, %v3067_v57  ;;  %v2387_v23 = vsel %vm247_vm1, %v2379_v20, 0 }
 0x27a   : > { %2354 = vmatprep.mubr.bf16.mxu0 %v3320_v0 }
 0x27b   : > { %v2261_v8 = vpop.permute.xlu0 %2260  ;;  %v2374_v31 = vpop.permute.xlu1 %2373 }
 0x27c   : > { %v2265_v22 = vsel %vm869_vm6, %v2259_v48, %v2261_v8  ;;  %v2380_v47 = vsel %vm4127_vm4, %v2372_v63, %v2374_v31  ;;  %v2381_v29 = vsel %vm4128_vm5, %v2374_v31, %v2376_v12  ;;  %vm4129_vm6 = vcmask 523264   ;;  %vm4141_vm4 = vmmov %vm4140_vm0 }
 0x27d   : > { %3074 = vmatmul.mubr.msk.bf16.vlgmr.msra.gmra.mxu1 %vm243_vm2, %v3072_v18  ;;  %3075 = vmatprep.subr.msk.bf16.mxu0 %vm247_vm1, %v2265_v22  ;;  %vm4130_vm7 = vmmov %vm4129_vm6  ;;  %v2393_v15 = vsel %vm247_vm1, %v2381_v29, 0 }
 0x27e   : > { %3078 = vmatprep.subr.msk.bf16.mxu1 %vm247_vm1, %v2380_v47  ;;  %2337 = vmatpush1.bf16.msra.mxu0 %v2276_v62  ;;  %vm4132_vm9 = vmmov %vm4129_vm6 }
 0x27f   : > { %2413 = vmatpush1.bf16.msra.mxu1 %v2387_v23  ;;  %v2487_v24 = vpop.permute.xlu0 %2486  ;;  %v2489_v27 = vpop.permute.xlu1 %2488  ;;  %2430 = vmatprep.mubr.bf16.mxu1 %v3320_v0  ;;  %vm4133_vm13 = vmmov %vm4129_vm6 }
 0x280   : > { %v2496_v52 = vsel %vm4129_vm6, %v2487_v24, %v2489_v27  ;;  %vm4144_vm5 = vmmov %vm4140_vm0 }
 0x281   : > { %3076 = vmatmul.mubr.msk.bf16.vlgmr.msra.gmra.mxu0 %vm243_vm2, %v3072_v18  ;;  %v2504_v25 = vsel %vm247_vm1, %v2496_v52, 0  ;;  %vm4145_vm6 = vmmov %vm4140_vm0 }
 0x282   : > { %2471 = vmatprep.mubr.bf16.mxu0 %v3320_v0 }
 0x283   : > { %v2491_v50 = vpop.permute.xlu0 %2490  ;;  %v2378_v1 = vpop.permute.xlu1 %2377 }
 0x284   : > { %v2497_v3 = vsel %vm4130_vm7, %v2489_v27, %v2491_v50  ;;  %v2382_v13 = vsel %vm4131_vm8, %v2376_v12, %v2378_v1 }
 0x285   : > { %3079 = vmatmul.mubr.msk.bf16.vlgmr.msra.gmra.mxu1 %vm243_vm2, %v3077_v37  ;;  %3080 = vmatprep.subr.msk.bf16.mxu0 %vm247_vm1, %v2382_v13 }
 0x286   : > { %3083 = vmatprep.subr.msk.bf16.mxu1 %vm247_vm1, %v2497_v3  ;;  %2454 = vmatpush1.bf16.msra.mxu0 %v2393_v15 }
 0x287   : > { %2530 = vmatpush1.bf16.msra.mxu1 %v2504_v25  ;;  %v2606_v26 = vpop.permute.xlu0 %2605  ;;  %v2493_v17 = vpop.permute.xlu1 %2492  ;;  %2547 = vmatprep.mubr.bf16.mxu1 %v3320_v0 }
 0x288   : > { %v2498_v28 = vsel %vm4132_vm9, %v2491_v50, %v2493_v17 }
 0x289   : > { %3081 = vmatmul.mubr.msk.bf16.vlgmr.msra.gmra.mxu0 %vm243_vm2, %v3077_v37  ;;  %v2510_v5 = vsel %vm247_vm1, %v2498_v28, 0 }
 0x28a   : > { %2588 = vmatprep.mubr.bf16.mxu0 %v3320_v0 }
 0x28b   : > { %v2495_v6 = vpop.permute.xlu0 %2494  ;;  %v2604_v33 = vpop.permute.xlu1 %2603 }
 0x28c   : > { %v2499_v55 = vsel %vm4133_vm13, %v2493_v17, %v2495_v6  ;;  %v2613_v35 = vsel %vm4134_vm14, %v2604_v33, %v2606_v26 }
 0x28d   : > { %3084 = vmatmul.mubr.msk.bf16.vlgmr.msra.gmra.mxu1 %vm243_vm2, %v3082_v7  ;;  %3085 = vmatprep.subr.msk.bf16.mxu0 %vm247_vm1, %v2499_v55  ;;  %v2621_v39 = vsel %vm247_vm1, %v2613_v35, 0 }
 0x28e   : > { %2571 = vmatpush1.bf16.msra.mxu0 %v2510_v5  ;;  %2664 = vmatprep.mubr.bf16.mxu1 %v3320_v0 }
 0x28f   : > { %v2610_v30 = vpop.permute.xlu0 %2609  ;;  %v2608_v36 = vpop.permute.xlu1 %2607 }
 0x290   : > { %v2614_v38 = vsel %vm4135_vm15, %v2606_v26, %v2608_v36  ;;  %v2615_v40 = vsel %vm4136_vm10, %v2608_v36, %v2610_v30 }
 0x291   : > { %3086 = vmatmul.mubr.msk.bf16.vlgmr.msra.gmra.mxu0 %vm243_vm2, %v3082_v7  ;;  %3088 = vmatprep.subr.msk.bf16.mxu1 %vm247_vm1, %v2614_v38  ;;  %v2627_v43 = vsel %vm247_vm1, %v2615_v40, 0 }
 0x292   : > { %2647 = vmatpush1.bf16.msra.mxu1 %v2621_v39  ;;  %2705 = vmatprep.mubr.bf16.mxu0 %v3320_v0 }
 0x293   : > { %v2721_v58 = vpop.permute.xlu0 %2720  ;;  %v2612_v19 = vpop.permute.xlu1 %2611 }
 0x294   : > { %v2616_v42 = vsel %vm4137_vm3, %v2610_v30, %v2612_v19 }
 0x295   : > { %3089 = vmatmul.mubr.msk.bf16.vlgmr.msra.gmra.mxu1 %vm243_vm2, %v3087_v41  ;;  %3090 = vmatprep.subr.msk.bf16.mxu0 %vm247_vm1, %v2616_v42 }
 0x296   : > { %2688 = vmatpush1.bf16.msra.mxu0 %v2627_v43  ;;  %2781 = vmatprep.mubr.bf16.mxu1 %v3320_v0 }
 0x297   : > { %v2725_v44 = vpop.permute.xlu0 %2724  ;;  %v2723_v46 = vpop.permute.xlu1 %2722 }
 0x298   : > { %v2730_v21 = vsel %vm4138_vm11, %v2721_v58, %v2723_v46  ;;  %v2731_v32 = vsel %vm4139_vm12, %v2723_v46, %v2725_v44 }
 0x299   : > { %v2738_v9 = vsel %vm247_vm1, %v2730_v21, 0  ;;  %3091 = vmatmul.mubr.msk.bf16.vlgmr.msra.gmra.mxu0 %vm243_vm2, %v3087_v41  ;;  %3093 = vmatprep.subr.msk.bf16.mxu1 %vm247_vm1, %v2731_v32 }
 0x29a   : > { %2764 = vmatpush1.bf16.msra.mxu1 %v2738_v9  ;;  %2822 = vmatprep.mubr.bf16.mxu0 %v3320_v0 }
 0x29b   : > { %v2729_v53 = vpop.permute.xlu0 %2728  ;;  %v2727_v54 = vpop.permute.xlu1 %2726 }
 0x29c   : > { %v2732_v34 = vsel %vm4140_vm0, %v2725_v44, %v2727_v54  ;;  %v2733_v45 = vsel %vm4141_vm4, %v2727_v54, %v2729_v53 }
 0x29d   : > { %v2744_v56 = vsel %vm247_vm1, %v2732_v34, 0  ;;  %3094 = vmatmul.mubr.msk.bf16.vlgmr.msra.gmra.mxu1 %vm243_vm2, %v3092_v51  ;;  %3095 = vmatprep.subr.msk.bf16.mxu0 %vm247_vm1, %v2733_v45  ;;  %vm4142_vm1 = vmmov %vm4140_vm0 }
 0x29e   : > { %2805 = vmatpush1.bf16.msra.mxu0 %v2744_v56 }
 0x2a1   : > { %3096 = vmatmul.mubr.msk.bf16.vlgmr.msra.gmra.mxu0 %vm243_vm2, %v3092_v51  ;;  %vm4143_vm2 = vmmov %vm4140_vm0 }
 0x2a8   : > { %v4055_v21 = vpop.permute.xlu1 %2836 }
 0x31d   : > { %v1871_v59 = vpop.f32.mrf.mxu1 }
 0x31f   : > { %v1873_v48 = vpop.f32.mrf.mxu1 }
 0x321   : > { %v1875_v60 = vpop.f32.mrf.mxu1  ;;  %v1912_v61 = vpop.f32.mrf.mxu0 }
 0x323   : > { %v1876_v0 = vpop.f32.mrf.mxu1  ;;  %v1914_v49 = vpop.f32.mrf.mxu0 }
 0x325   : > { %v1916_v57 = vpop.f32.mrf.mxu0  ;;  %v1968_v63 = vpop.f32.mrf.mxu1 }
 0x326   : > { %v1969_v19 = vadd.f32 %v1968_v63, %v1871_v59 }
 0x327   : > { %v1917_v2 = vpop.f32.mrf.mxu0  ;;  %v1970_v4 = vpop.f32.mrf.mxu1 }
 0x328   : > { %v1971_v44 = vadd.f32 %v1970_v4, %v1873_v48  ;;  %v2852_v4 = vpop.permute.xlu1 %2851 }
 0x329   : > { %v1972_v10 = vpop.f32.mrf.mxu1  ;;  %v2009_v11 = vpop.f32.mrf.mxu0 }
 0x32a   : > { %v2010_v51 = vadd.f32 %v2009_v11, %v1912_v61 }
 0x32b   : > { %v1973_v12 = vpop.f32.mrf.mxu1  ;;  %v2011_v14 = vpop.f32.mrf.mxu0 }
 0x32c   : > { %v2012_v56 = vadd.f32 %v2011_v14, %v1914_v49 }
 0x32d   : > { %v2013_v16 = vpop.f32.mrf.mxu0  ;;  %v2081_v18 = vpop.f32.mrf.mxu1 }
 0x32e   : > { %v2129_v46 = vadd.f32 %v2081_v18, %v1969_v19  ;;  %v2845_v16 = vpop.permute.xlu0 %2844 }
 0x32f   : > { %v2014_v20 = vpop.f32.mrf.mxu0  ;;  %v2083_v8 = vpop.f32.mrf.mxu1 }
 0x330   : > { %v2130_v53 = vadd.f32 %v2083_v8, %v1971_v44 }
 0x331   : > { %v2085_v31 = vpop.f32.mrf.mxu1  ;;  %v2122_v22 = vpop.f32.mrf.mxu0 }
 0x332   : > { %v2131_v60 = vadd.f32 %v2122_v22, %v2010_v51 }
 0x333   : > { %v2086_v47 = vpop.f32.mrf.mxu1  ;;  %v2124_v62 = vpop.f32.mrf.mxu0 }
 0x334   : > { %v2132_v59 = vadd.f32 %v2124_v62, %v2012_v56 }
 0x335   : > { %v2126_v23 = vpop.f32.mrf.mxu0  ;;  %v2198_v24 = vpop.f32.mrf.mxu1 }
 0x336   : > { %v2246_v54 = vadd.f32 %v2198_v24, %v2129_v46 }
 0x337   : > { %v2127_v27 = vpop.f32.mrf.mxu0  ;;  %v2200_v29 = vpop.f32.mrf.mxu1 }
 0x338   : > { %v2247_v0 = vadd.f32 %v2200_v29, %v2130_v53 }
 0x339   : > { %v2202_v37 = vpop.f32.mrf.mxu1  ;;  %v2239_v52 = vpop.f32.mrf.mxu0 }
 0x33a   : > { %v2248_v63 = vadd.f32 %v2239_v52, %v2131_v60 }
 0x33b   : > { %v2203_v50 = vpop.f32.mrf.mxu1  ;;  %v2241_v1 = vpop.f32.mrf.mxu0 }
 0x33c   : > { %v2249_v31 = vadd.f32 %v2241_v1, %v2132_v59 }
 0x33d   : > { %v2243_v3 = vpop.f32.mrf.mxu0  ;;  %v2315_v13 = vpop.f32.mrf.mxu1 }
 0x33e   : > { %v2363_v57 = vadd.f32 %v2315_v13, %v2246_v54  ;;  %v2854_v3 = vpop.permute.xlu1 %2853  ;;  %v2856_v13 = vpop.permute.xlu0 %2855 }
 0x33f   : > { %v2244_v15 = vpop.f32.mrf.mxu0  ;;  %v2317_v25 = vpop.f32.mrf.mxu1 }
 0x340   : > { %v2364_v12 = vadd.f32 %v2317_v25, %v2247_v0 }
 0x341   : > { %v2319_v26 = vpop.f32.mrf.mxu1  ;;  %v2356_v17 = vpop.f32.mrf.mxu0 }
 0x342   : > { %v2365_v61 = vadd.f32 %v2356_v17, %v2248_v63 }
 0x343   : > { %v2320_v28 = vpop.f32.mrf.mxu1  ;;  %v2358_v7 = vpop.f32.mrf.mxu0 }
 0x344   : > { %v2366_v49 = vadd.f32 %v2358_v7, %v2249_v31 }
 0x345   : > { %v2360_v6 = vpop.f32.mrf.mxu0  ;;  %v2432_v33 = vpop.f32.mrf.mxu1 }
 0x346   : > { %v2480_v48 = vadd.f32 %v2432_v33, %v2363_v57 }
 0x347   : > { %v2361_v55 = vpop.f32.mrf.mxu0  ;;  %v2434_v5 = vpop.f32.mrf.mxu1 }
 0x348   : > { %v2481_v11 = vadd.f32 %v2434_v5, %v2364_v12 }
 0x349   : > { %v2436_v35 = vpop.f32.mrf.mxu1  ;;  %v2473_v30 = vpop.f32.mrf.mxu0 }
 0x34a   : > { %v2482_v14 = vadd.f32 %v2473_v30, %v2365_v61  ;;  %v2862_v30 = vsel %vm4142_vm1, %v2852_v4, %v2854_v3 }
 0x34b   : > { %v2437_v36 = vpop.f32.mrf.mxu1  ;;  %v2475_v38 = vpop.f32.mrf.mxu0 }
 0x34c   : > { %v2483_v62 = vadd.f32 %v2475_v38, %v2366_v49  ;;  %v2863_v38 = vsel %vm4143_vm2, %v2854_v3, %v2856_v13 }
 0x34d   : > { %v2477_v39 = vpop.f32.mrf.mxu0  ;;  %v2549_v40 = vpop.f32.mrf.mxu1 }
 0x34e   : > { %v2597_v8 = vadd.f32 %v2549_v40, %v2480_v48 }
 0x34f   : > { %v2478_v41 = vpop.f32.mrf.mxu0  ;;  %v2551_v58 = vpop.f32.mrf.mxu1 }
 0x350   : > { %v2598_v22 = vadd.f32 %v2551_v58, %v2481_v11 }
 0x351   : > { %v2553_v42 = vpop.f32.mrf.mxu1  ;;  %v2590_v43 = vpop.f32.mrf.mxu0 }
 0x352   : > { %v2599_v37 = vadd.f32 %v2590_v43, %v2482_v14  ;;  %v2858_v42 = vpop.permute.xlu1 %2857  ;;  %v2860_v43 = vpop.permute.xlu0 %2859 }
 0x353   : > { %v2554_v32 = vpop.f32.mrf.mxu1  ;;  %v2592_v9 = vpop.f32.mrf.mxu0  ;;  %v2864_v53 = vsel %vm4144_vm5, %v2856_v13, %v2858_v42 }
 0x354   : > { %v2600_v1 = vadd.f32 %v2592_v9, %v2483_v62 }
 0x355   : > { %v2594_v34 = vpop.f32.mrf.mxu0  ;;  %v2666_v45 = vpop.f32.mrf.mxu1 }
 0x356   : > { %v2714_v24 = vadd.f32 %v2666_v45, %v2597_v8  ;;  %v2865_v34 = vsel %vm4145_vm6, %v2858_v42, %v2860_v43 }
 0x357   : > { %v2595_v2 = vpop.f32.mrf.mxu0  ;;  %v2668_v10 = vpop.f32.mrf.mxu1 }
 0x358   : > { %v2715_v52 = vadd.f32 %v2668_v10, %v2598_v22 }
 0x359   : > { %v2670_v18 = vpop.f32.mrf.mxu1  ;;  %v2707_v20 = vpop.f32.mrf.mxu0 }
 0x35a   : > { %v2716_v26 = vadd.f32 %v2707_v20, %v2599_v37 }
 0x35b   : > { %v2671_v47 = vpop.f32.mrf.mxu1  ;;  %v2709_v23 = vpop.f32.mrf.mxu0 }
 0x35c   : > { %v2717_v33 = vadd.f32 %v2709_v23, %v2600_v1 }
 0x35d   : > { %v2711_v27 = vpop.f32.mrf.mxu0  ;;  %v2783_v29 = vpop.f32.mrf.mxu1 }
 0x35e   : > { %v2831_v50 = vadd.f32 %v2783_v29, %v2714_v24 }
 0x35f   : > { %v2712_v15 = vpop.f32.mrf.mxu0  ;;  %v2785_v25 = vpop.f32.mrf.mxu1 }
 0x360   : > { %v2839_v17 = vmul.f32 %v4055_v21, %v2831_v50  ;;  %v2832_v28 = vadd.f32 %v2785_v25, %v2715_v52 }
 0x361   : > { %v2824_v6 = vpop.f32.mrf.mxu0  ;;  %v2787_v7 = vpop.f32.mrf.mxu1 }
 0x362   : > { %v2840_v55 = vmul.f32 %v4055_v21, %v2832_v28  ;;  %v2833_v5 = vadd.f32 %v2824_v6, %v2716_v26  ;;  %v2847_v35 = vadd.f32 %v2845_v16, %v2839_v17 }
 0x363   : > { %v2826_v36 = vpop.f32.mrf.mxu0  ;;  %v2788_v39 = vpop.f32.mrf.mxu1 }
 0x364   : > { %v2841_v40 = vmul.f32 %v4055_v21, %v2833_v5  ;;  %v2870_v41 = vadd.f32 %v2862_v30, %v2847_v35  ;;  %v2834_v58 = vadd.f32 %v2826_v36, %v2717_v33  ;;  %v2848_v19 = vadd.f32 %v2845_v16, %v2840_v55 }
 0x365   : > { %v2828_v44 = vpop.f32.mrf.mxu0 }
 0x366   : > { %v2849_v46 = vadd.f32 %v2845_v16, %v2841_v40  ;;  %v2878_v32 = vmul.f32 0.044715, %v2870_v41  ;;  %v2842_v9 = vmul.f32 %v4055_v21, %v2834_v58  ;;  %v2871_v51 = vadd.f32 %v2863_v38, %v2848_v19 }
 0x367   : > { %v2829_v54 = vpop.f32.mrf.mxu0  ;;  %v2874_v24 = vmul.f32 0.5, %v2870_v41 }
 0x368   : > { %v2882_v45 = vmul.f32 %v2878_v32, %v2870_v41  ;;  %v2850_v56 = vadd.f32 %v2845_v16, %v2842_v9  ;;  %v2879_v60 = vmul.f32 0.044715, %v2871_v51  ;;  %v2872_v0 = vadd.f32 %v2864_v53, %v2849_v46 }
 0x369   : > { %v2875_v27 = vmul.f32 0.5, %v2871_v51 }
 0x36a   : > { %v2886_v57 = vmul.f32 %v2882_v45, %v2870_v41  ;;  %v2883_v2 = vmul.f32 %v2879_v60, %v2871_v51  ;;  %v2880_v10 = vmul.f32 0.044715, %v2872_v0  ;;  %v2873_v59 = vadd.f32 %v2865_v34, %v2850_v56 }
 0x36b   : > { %v2876_v13 = vmul.f32 0.5, %v2872_v0 }
 0x36c   : > { %v2890_v63 = vadd.f32 %v2886_v57, %v2870_v41  ;;  %v2887_v12 = vmul.f32 %v2883_v2, %v2871_v51  ;;  %v2884_v48 = vmul.f32 %v2880_v10, %v2872_v0  ;;  %v2881_v4 = vmul.f32 0.044715, %v2873_v59 }
 0x36d   : > { %v2877_v15 = vmul.f32 0.5, %v2873_v59 }
 0x36e   : > { %v2891_v21 = vadd.f32 %v2887_v12, %v2871_v51  ;;  %v2888_v18 = vmul.f32 %v2884_v48, %v2872_v0  ;;  %v2885_v20 = vmul.f32 %v2881_v4, %v2873_v59  ;;  %v2894_v31 = vmul.f32 0.7978846, %v2890_v63 }
 0x370   : > { %v2892_v61 = vadd.f32 %v2888_v18, %v2872_v0  ;;  %v2889_v11 = vmul.f32 %v2885_v20, %v2873_v59  ;;  %v2895_v8 = vmul.f32 0.7978846, %v2891_v21  ;;  %3246 = vtanh.f32 %v2894_v31 }
 0x372   : > { %v2893_v16 = vadd.f32 %v2889_v11, %v2873_v59  ;;  %v2896_v47 = vmul.f32 0.7978846, %v2892_v61  ;;  %3248 = vtanh.f32 %v2895_v8 }
 0x374   : > { %v2897_v23 = vmul.f32 0.7978846, %v2893_v16  ;;  %3250 = vtanh.f32 %v2896_v47 }
 0x376   : > { %3252 = vtanh.f32 %v2897_v23 }
 0x37d   : > { %v3247_v49 = vpop.eup %3246 }
 0x37e   : > { %v2902_v14 = vadd.f32 1.0, %v3247_v49 }
 0x37f   : > { %v3249_v22 = vpop.eup %3248 }
 0x380   : > { %v2903_v29 = vadd.f32 1.0, %v3249_v22  ;;  %v2906_v52 = vmul.f32 %v2902_v14, %v2874_v24 }
 0x381   : > { %v3251_v62 = vpop.eup %3250 }
 0x382   : > { %v2904_v37 = vadd.f32 1.0, %v3251_v62  ;;  %v2907_v50 = vmul.f32 %v2903_v29, %v2875_v27 }
 0x383   : > { %v3253_v3 = vpop.eup %3252 }
 0x384   : > { %v2905_v25 = vadd.f32 1.0, %v3253_v3  ;;  %v2914_v1 = vcombine.low %v2906_v52, %v2907_v50  ;;  %v2908_v26 = vmul.f32 %v2904_v37, %v2876_v13 }
 0x386   : > { %v2909_v17 = vmul.f32 %v2905_v25, %v2877_v15  ;;  %2918 = vst [vmem:[%s190_s11] sm:$0xff] %v2914_v1 }
 0x388   : > { %v2915_v28 = vcombine.low %v2908_v26, %v2909_v17 }
 0x38a   : > { %2919 = vst [vmem:[%s190_s11 + $0x8] sm:$0xff] %v2915_v28 }
 0x38b   : > { %3271 = shalt.err (!%p3268_p3)
}
 0x38c   : > { %s3272_s22 = scalar_lea.hbm %s2933_s28, 256  ;;  %s3276_s7 = scalar_lea.hbm %s4103_s4, 512 }
 0x38d   : > { %p3273_p4 = scmp.ne.s32.totalorder %s2933_s28, %s3272_s22  ;;  %p3277_p9 = scmp.lt.s32.totalorder %s2933_s28, %s4103_s4 }
 0x38e   : > { %p3278_p10 = scmp.lt.s32.totalorder %s3276_s7, %s3272_s22 }
 0x38f   : > { %p3274_p7 = pnand %p3273_p4, %p3398_p5 }
 0x390   : > { %p3279_p11 = por %p3278_p10, %p3277_p9 }
 0x391   : > { %p3275_p8 = pneg %p3274_p7 }
 0x393   : > { %p3280_p12 = pnand %p3279_p11, %p3275_p8 }
 0x395   : > { %3283 = shalt.err (!%p3280_p12)
}
 0x396   : > { %3176 = dma.vmem_to_hbm [thread:$0]  (%p3398_p5), %s2936_s12, 256, %s2933_s28, %s2921_s29  }
 0x397 PF: > { %p3182_p13 = scmp.ge.s32.totalorder %s3318_s18, 2  ;;  %s2947_s9 = sand.u32 1, %s3306_s15  }
 0x398   : > { %s2948_s10 = scalar_lea.sflag [#allocation3], %s2947_s9 }
 0x399   : > { %p3179_p0 = pnand %p3182_p13, %p3402_p6 }
 0x39b   : > { %p3180_p1 = pneg %p3179_p0 }
 0x39d   : > { %3301 = dma.done.wait (%p3180_p1), %s2948_s10, 256  }
 0x39e   : > { %3303 = vsyncadd (%p3180_p1), %s2948_s10, 4294967040  ;;  %p14_p2 = scmp.ge.s32.totalorder %s3385_s21, 4   ;;  %s4146_s15 = smov %s3310_s16 }
 0x39f   : > { %s4147_s16 = smov %s3314_s17  ;;  %s4148_s17 = smov %s3396_s24 }
 0x3a0   : > { %s4149_s18 = smov %s3385_s21  ;;  %16 = sbr.rel (!%p14_p2) target bundleno = 3 (0x3), region = 87 }
 0x3a5   :  { %2953 = vsyncpa [#allocation3], 1 }
 0x3a6   :  { %2955 = vsyncpa [#allocation3 + $0x1], 1 }

</bundles_post_ra>
